<compile_context>
chip_gen: v7x
topology: tpu7x:2x2x1
jax: 0.10.0
libtpu: 0.0.40
codegen_flags: <defaults>
</compile_context>

<pallas_src>
import math

import jax
import jax.numpy as jnp
from jax import lax
from jax.experimental import pallas as pl
from jax.experimental.pallas import tpu as pltpu


def _layer_norm(x, g, b):
    mu = jnp.mean(x, axis=-1, keepdims=True)
    var = jnp.mean(jnp.square(x - mu), axis=-1, keepdims=True)
    return (x - mu) * lax.rsqrt(var + jnp.float32(1e-5)) * g + b


# --------------------------- fused per-(batch, q-tile) kernel ---------------------------
def _cl4kt_kernel(apply_pos, n_heads, d_k,
                  gamma_ref,                          # (H,1,1) f32 = -softplus(gammas)
                  q_in_ref, k_in_ref, v_in_ref,       # (TQ,D) f32 / (S,D) bf16 / (S,D) bf16
                  bias_ref, mask_ref, suffix_ref, pos_ref,   # (TQ,S) f32 / (TQ,S) f32 / (S,S) bf16 / (TQ,S) f32
                  wq_ref, bq_ref, wk_ref, bk_ref, wv_ref, bv_ref, wo_ref, bo_ref,
                  ln1g_ref, ln1b_ref, w1_ref, b1_ref, w2_ref, b2_ref,
                  ln2g_ref, ln2b_ref,
                  out_ref, attn_ref,                  # attn_ref may be None
                  k_scr, v_scr, q_scr, cat_scr):
    f32, bf16 = jnp.float32, jnp.bfloat16
    TQ, D = q_in_ref.shape
    S = k_in_ref.shape[0]
    H, dk = n_heads, d_k
    inv_sqrt_dk = f32(1.0 / math.sqrt(dk))

    # ---- K / V projections: once per batch element (qi axis is innermost & "arbitrary",
    #      so qi == 0 always runs first for each b and the scratch persists across tiles).
    @pl.when(pl.program_id(1) == 0)
    def _():
        k_full = jnp.dot(k_in_ref[...], wk_ref[...], preferred_element_type=f32) + bk_ref[...]
        v_full = jnp.dot(v_in_ref[...], wv_ref[...], preferred_element_type=f32) + bv_ref[...]
        k_bf = k_full.astype(bf16)
        v_bf = v_full.astype(bf16)
        for h in range(H):                            # cheap static lane-slice copies
            lo = h * dk
            k_scr[h, :, :] = k_bf[:, lo:lo + dk]
            v_scr[h, :, :] = v_bf[:, lo:lo + dk]

    # ---- Q projection for this query-row tile ---------------------------------------
    x_q = q_in_ref[...]                               # (TQ, D) f32 residual input
    q_full = jnp.dot(x_q.astype(bf16), wq_ref[...], preferred_element_type=f32) + bq_ref[...]
    q_bf = (q_full * inv_sqrt_dk).astype(bf16)        # fold 1/sqrt(d_k) into Q
    for h in range(H):
        lo = h * dk
        q_scr[h, :, :] = q_bf[:, lo:lo + dk]

    q_h = q_scr[...]                                  # (H, TQ, dk) bf16
    k_h = k_scr[...]                                  # (H, S,  dk) bf16
    v_h = v_scr[...]                                  # (H, S,  dk) bf16

    # ---- batched-over-heads attention core -------------------------------------------
    scores = jnp.einsum('hqd,hkd->hqk', q_h, k_h,
                        preferred_element_type=f32)   # (H, TQ, S) f32

    bias = bias_ref[...]                              # 0 visible / -1e32 masked
    maskm = mask_ref[...]                             # 1 visible / 0 masked
    pos = pos_ref[...]                                # |i - j|

    # "individual features" distance decay (the torch.no_grad block)
    s1 = scores + bias
    e1 = jnp.exp(s1 - jnp.max(s1, axis=-1, keepdims=True))
    scores_ = (e1 / jnp.sum(e1, axis=-1, keepdims=True)) * maskm    # exact reciprocal here
    # (disttotal - distcum)[.., j] == sum_{k > j} scores_[.., k]  -> one flat matmul
    tail = jnp.dot(scores_.reshape(H * TQ, S).astype(bf16), suffix_ref[...],
                   preferred_element_type=f32).reshape(H, TQ, S)
    dist = jnp.sqrt(jnp.maximum(tail * pos, 0.0))
    total_effect = jnp.clip(jnp.exp(dist * gamma_ref[...]), 1e-5, 1e5)

    s2 = scores * total_effect + bias                 # additive mask == masked_fill here
    e2 = jnp.exp(s2 - jnp.max(s2, axis=-1, keepdims=True))
    attn = e2 * pl.reciprocal(jnp.sum(e2, axis=-1, keepdims=True), approx=True)  # (H,TQ,S)

    if attn_ref is not None:                          # single contiguous (H, TQ, S) store
        attn_ref[...] = attn.astype(attn_ref.dtype)
    attn_bf = attn.astype(bf16)
    # TODO(synk): attention dropout omitted (identity at eval).

    head_out = jnp.einsum('hqk,hkd->hqd', attn_bf, v_h,
                          preferred_element_type=f32)             # (H, TQ, dk) f32
    for h in range(H):                                # concat heads -> (TQ, D) bf16 buffer
        lo = h * dk
        cat_scr[:, lo:lo + dk] = head_out[h].astype(bf16)

    attn_out = jnp.dot(cat_scr[...], wo_ref[...], preferred_element_type=f32) + bo_ref[...]

    # residual + LayerNorm1 (dropout1 identity at eval)
    y = _layer_norm(x_q + attn_out, ln1g_ref[...], ln1b_ref[...])

    if apply_pos:
        hdn = jnp.dot(y.astype(bf16), w1_ref[...], preferred_element_type=f32) + b1_ref[...]
        # exact (erf) GELU, matching torch.nn.GELU default
        hdn = 0.5 * hdn * (1.0 + lax.erf(hdn * f32(1.0 / math.sqrt(2.0))))
        y2 = jnp.dot(hdn.astype(bf16), w2_ref[...], preferred_element_type=f32) + b2_ref[...]
        # dropout / dropout2 omitted (identity at eval)
        y = _layer_norm(y + y2, ln2g_ref[...], ln2b_ref[...])

    out_ref[...] = y.astype(out_ref.dtype)


# ---------------------------------------- wrapper ----------------------------------------
def _pick_query_tile(S):
    # bound the per-step (H, TQ, S) working set (v7x: 64 MiB VMEM / 32 MiB scoped default)
    if S > 128 and S % 128 == 0:
        return 128
    return S


def cl4kt_transformer_layer(params, mask_flag, query, key, values, apply_pos=True,
                            return_attn=True, attn_dtype=jnp.bfloat16):
    B, S, D = query.shape
    H = params["n_heads"]
    d_k = D // H
    F_ff = params["w1"].shape[1]
    f32, bf16 = jnp.float32, jnp.bfloat16

    TQ = _pick_query_tile(S)
    NQ = S // TQ

    if mask_flag in (0, 1):
        nopeek = jnp.triu(jnp.ones((S, S), f32), k=mask_flag)
        mask_mult = (nopeek == 0).astype(f32)               # 1.0 = visible
    else:                                                    # "bert" mask: all visible
        mask_mult = jnp.ones((S, S), f32)
    bias_add = jnp.where(mask_mult > 0, 0.0, -1e32).astype(f32)

    idx = jnp.arange(S, dtype=f32)
    pos_eff = jnp.abs(idx[None, :] - idx[:, None]).astype(f32)       # |i - j|
    # strictly-lower-triangular ones: (scores_ @ suffix)[i,j] = sum_{k>j} scores_[i,k]
    suffix = (idx[:, None] > idx[None, :]).astype(bf16)

    wq = params["wk"] if params["kq_same"] else params["wq"]
    bq = params["bk"] if params["kq_same"] else params["bq"]
    gamma_neg = (-jax.nn.softplus(params["gammas"])).reshape(H, 1, 1).astype(f32)

    row = lambda a: a.reshape(1, -1).astype(f32)
    w_bf = lambda w: w.astype(bf16)

    q_spec = pl.BlockSpec((None, TQ, D), lambda b, qi: (b, qi, 0))
    kv_spec = pl.BlockSpec((None, S, D), lambda b, qi: (b, 0, 0))
    qs_spec = pl.BlockSpec((TQ, S), lambda b, qi: (qi, 0))
    ss_spec = pl.BlockSpec((S, S), lambda b, qi: (0, 0))
    gamma_spec = pl.BlockSpec((H, 1, 1), lambda b, qi: (0, 0, 0))
    cw = lambda shape: pl.BlockSpec(shape, lambda b, qi: (0, 0))

    in_specs = [gamma_spec, q_spec, kv_spec, kv_spec,
                qs_spec, qs_spec, ss_spec, qs_spec,
                cw((D, D)), cw((1, D)), cw((D, D)), cw((1, D)),
                cw((D, D)), cw((1, D)), cw((D, D)), cw((1, D)),
                cw((1, D)), cw((1, D)),
                cw((D, F_ff)), cw((1, F_ff)), cw((F_ff, D)), cw((1, D)),
                cw((1, D)), cw((1, D))]
    n_in = len(in_specs)

    out_spec_y = pl.BlockSpec((None, TQ, D), lambda b, qi: (b, qi, 0))
    if return_attn:
        out_shape = (jax.ShapeDtypeStruct((B, S, D), f32),
                     jax.ShapeDtypeStruct((B, H, S, S), attn_dtype))
        out_specs = (out_spec_y,
                     pl.BlockSpec((None, H, TQ, S), lambda b, qi: (b, 0, qi, 0)))
    else:
        out_shape = jax.ShapeDtypeStruct((B, S, D), f32)
        out_specs = out_spec_y

    scratch_shapes = [pltpu.VMEM((H, S, d_k), bf16),    # K heads (persist across q-tiles)
                      pltpu.VMEM((H, S, d_k), bf16),    # V heads (persist across q-tiles)
                      pltpu.VMEM((H, TQ, d_k), bf16),   # Q heads (this tile)
                      pltpu.VMEM((TQ, D), bf16)]        # concat(head outputs)

    def kernel(*refs):
        ins = refs[:n_in]
        if return_attn:
            out_ref, attn_ref = refs[n_in], refs[n_in + 1]
            scratch = refs[n_in + 2:]
        else:
            out_ref, attn_ref = refs[n_in], None
            scratch = refs[n_in + 1:]
        _cl4kt_kernel(apply_pos, H, d_k, *ins, out_ref, attn_ref, *scratch)

    result = pl.pallas_call(
        kernel,
        out_shape=out_shape,
        grid=(B, NQ),
        in_specs=in_specs,
        out_specs=out_specs,
        scratch_shapes=scratch_shapes,
        # qi axis stays "arbitrary": K/V scratch is carried across query-row tiles.
        # TODO(synk): on v7x (2 TCs) a second parallel axis would help when B is small;
        #             that would require recomputing K/V per tile instead of caching them.
        compiler_params=pltpu.CompilerParams(
            dimension_semantics=("parallel", "arbitrary"),
            vmem_limit_bytes=64 * 1024 * 1024),
    )(gamma_neg,
      query.astype(f32), key.astype(bf16), values.astype(bf16),
      bias_add, mask_mult, suffix, pos_eff,
      w_bf(wq), row(bq), w_bf(params["wk"]), row(params["bk"]),
      w_bf(params["wv"]), row(params["bv"]),
      w_bf(params["wo"]), row(params["bo"]),
      row(params["ln1_g"]), row(params["ln1_b"]),
      w_bf(params["w1"]), row(params["b1"]),
      w_bf(params["w2"]), row(params["b2"]),
      row(params["ln2_g"]), row(params["ln2_b"]))

    return result


# --------------------------------- pure-JAX f32 reference ---------------------------------
def reference(params, mask_flag, query, key, values, apply_pos=True):
    B, S, D = query.shape
    H = params["n_heads"]
    d_k = D // H
    lin = lambda x, w, b: x @ w + b

    wq = params["wk"] if params["kq_same"] else params["wq"]
    bq = params["bk"] if params["kq_same"] else params["bq"]
    q = lin(query, wq, bq).reshape(B, S, H, d_k).transpose(0, 2, 1, 3)
    k = lin(key, params["wk"], params["bk"]).reshape(B, S, H, d_k).transpose(0, 2, 1, 3)
    v = lin(values, params["wv"], params["bv"]).reshape(B, S, H, d_k).transpose(0, 2, 1, 3)

    if mask_flag in (0, 1):
        mask = (jnp.triu(jnp.ones((S, S)), k=mask_flag) == 0).astype(jnp.float32)[None, None]
    else:
        mask = jnp.ones((1, 1, S, S), jnp.float32)

    neg = -1e32
    scores = q @ jnp.swapaxes(k, -1, -2) / math.sqrt(d_k)
    scores_ = jax.nn.softmax(jnp.where(mask == 0, neg, scores), axis=-1) * mask
    distcum = jnp.cumsum(scores_, axis=-1)
    disttotal = jnp.sum(scores_, axis=-1, keepdims=True)
    pe = jnp.abs(jnp.arange(S)[None, :] - jnp.arange(S)[:, None]).astype(jnp.float32)[None, None]
    dist = jnp.sqrt(jnp.clip((disttotal - distcum) * pe, 0.0))
    gamma = -jax.nn.softplus(params["gammas"])[None]             # (1, H, 1, 1)
    total_effect = jnp.clip(jnp.exp(dist * gamma), 1e-5, 1e5)
    scores = jnp.where(mask == 0, neg, scores * total_effect)
    attn = jax.nn.softmax(scores, axis=-1)
    out = attn @ v
    concat = out.transpose(0, 2, 1, 3).reshape(B, S, D)
    attn_out = lin(concat, params["wo"], params["bo"])

    def ln(x, g, b):
        mu = x.mean(-1, keepdims=True)
        var = ((x - mu) ** 2).mean(-1, keepdims=True)
        return (x - mu) / jnp.sqrt(var + 1e-5) * g + b

    qr = ln(query + attn_out, params["ln1_g"], params["ln1_b"])
    if apply_pos:
        h = jax.nn.gelu(lin(qr, params["w1"], params["b1"]), approximate=False)
        q2 = lin(h, params["w2"], params["b2"])
        qr = ln(qr + q2, params["ln2_g"], params["ln2_b"])
    return qr, attn


# ----------------------------------------- params -----------------------------------------
def init_params(key, d_model, d_ff, n_heads, kq_same=False):
    ks = jax.random.split(key, 10)

    def xavier(k, shape):
        bound = math.sqrt(6.0 / (shape[0] + shape[1]))
        return jax.random.uniform(k, shape, jnp.float32, -bound, bound)

    return dict(
        n_heads=n_heads, kq_same=kq_same,
        wq=xavier(ks[0], (d_model, d_model)), bq=jnp.zeros((d_model,), jnp.float32),
        wk=xavier(ks[1], (d_model, d_model)), bk=jnp.zeros((d_model,), jnp.float32),
        wv=xavier(ks[2], (d_model, d_model)), bv=jnp.zeros((d_model,), jnp.float32),
        wo=xavier(ks[3], (d_model, d_model)), bo=jnp.zeros((d_model,), jnp.float32),
        gammas=0.1 * jax.random.normal(ks[4], (n_heads, 1, 1), jnp.float32),
        ln1_g=jnp.ones((d_model,), jnp.float32), ln1_b=jnp.zeros((d_model,), jnp.float32),
        w1=xavier(ks[5], (d_model, d_ff)),
        b1=0.01 * jax.random.normal(ks[6], (d_ff,), jnp.float32),
        w2=xavier(ks[7], (d_ff, d_model)),
        b2=0.01 * jax.random.normal(ks[8], (d_model,), jnp.float32),
        ln2_g=jnp.ones((d_model,), jnp.float32), ln2_b=jnp.zeros((d_model,), jnp.float32),
    )


if __name__ == "__main__":
    B, S, D, H, F = 2, 8, 32, 4, 64   # batch, seq, d_model, n_heads, d_ff
    root = jax.random.PRNGKey(0)
    kp, kq, kk, kv = jax.random.split(root, 4)
    params = init_params(kp, D, F, H, kq_same=False)
    query = jax.random.normal(kq, (B, S, D), jnp.float32)
    key_in = jax.random.normal(kk, (B, S, D), jnp.float32)
    values = jax.random.normal(kv, (B, S, D), jnp.float32)

    out, attn = cl4kt_transformer_layer(params, 1, query, key_in, values, apply_pos=True)
    out = jax.block_until_ready(out)
    attn = jax.block_until_ready(attn)

    ref_out, ref_attn = reference(params, 1, query, key_in, values, apply_pos=True)

    # bf16 MXU inputs / bf16 attention output -> compare at bf16-appropriate tolerance.
    attn_f32 = attn.astype(jnp.float32)
    assert jnp.allclose(out, ref_out, atol=2e-2, rtol=2e-2), \
        float(jnp.max(jnp.abs(out - ref_out)))
    assert jnp.allclose(attn_f32, ref_attn, atol=2e-2, rtol=2e-2), \
        float(jnp.max(jnp.abs(attn_f32 - ref_attn)))

    # fast path: skip the O(B*H*S^2) attention-probability writeback entirely.
    out_only = cl4kt_transformer_layer(params, 1, query, key_in, values,
                                       apply_pos=True, return_attn=False)
    out_only = jax.block_until_ready(out_only)
    assert jnp.allclose(out_only, ref_out, atol=2e-2, rtol=2e-2), \
        float(jnp.max(jnp.abs(out_only - ref_out)))

    print("KERNEL_OK")
</pallas_src>

<mosaic_0001>
module attributes {stable_mosaic.version = 11 : i64} {
  func.func @kernel(%arg0: i32, %arg1: i32, %arg2: memref<4x1x1xf32, #tpu.memory_space<vmem>>, %arg3: memref<1x8x32xf32, #tpu.memory_space<vmem>>, %arg4: memref<1x8x32xbf16, #tpu.memory_space<vmem>>, %arg5: memref<1x8x32xbf16, #tpu.memory_space<vmem>>, %arg6: memref<8x8xf32, #tpu.memory_space<vmem>>, %arg7: memref<8x8xf32, #tpu.memory_space<vmem>>, %arg8: memref<8x8xbf16, #tpu.memory_space<vmem>>, %arg9: memref<8x8xf32, #tpu.memory_space<vmem>>, %arg10: memref<32x32xbf16, #tpu.memory_space<vmem>>, %arg11: memref<1x32xf32, #tpu.memory_space<vmem>>, %arg12: memref<32x32xbf16, #tpu.memory_space<vmem>>, %arg13: memref<1x32xf32, #tpu.memory_space<vmem>>, %arg14: memref<32x32xbf16, #tpu.memory_space<vmem>>, %arg15: memref<1x32xf32, #tpu.memory_space<vmem>>, %arg16: memref<32x32xbf16, #tpu.memory_space<vmem>>, %arg17: memref<1x32xf32, #tpu.memory_space<vmem>>, %arg18: memref<1x32xf32, #tpu.memory_space<vmem>>, %arg19: memref<1x32xf32, #tpu.memory_space<vmem>>, %arg20: memref<32x64xbf16, #tpu.memory_space<vmem>>, %arg21: memref<1x64xf32, #tpu.memory_space<vmem>>, %arg22: memref<64x32xbf16, #tpu.memory_space<vmem>>, %arg23: memref<1x32xf32, #tpu.memory_space<vmem>>, %arg24: memref<1x32xf32, #tpu.memory_space<vmem>>, %arg25: memref<1x32xf32, #tpu.memory_space<vmem>>, %arg26: memref<1x8x32xf32, #tpu.memory_space<vmem>>, %arg27: memref<1x4x8x8xbf16, #tpu.memory_space<vmem>>, %arg28: memref<4x8x8xbf16, #tpu.memory_space<vmem>>, %arg29: memref<4x8x8xbf16, #tpu.memory_space<vmem>>, %arg30: memref<4x8x8xbf16, #tpu.memory_space<vmem>>, %arg31: memref<8x32xbf16, #tpu.memory_space<vmem>>) attributes {dimension_semantics = [#tpu.dimension_semantics<parallel>, #tpu.dimension_semantics<arbitrary>], iteration_bounds = array<i64: 2, 1>, scalar_prefetch = 0 : i64, scratch_operands = 4 : i64, tpu.core_type = #tpu.core_type<tc>, window_params = [{pipeline_mode = #tpu.pipeline_mode<synchronous>, transform_indices = @transform_0, window_bounds = array<i64: 4, 1, 1>}, {transform_indices = @transform_1, window_bounds = array<i64: 1, 8, 32>}, {transform_indices = @transform_2, window_bounds = array<i64: 1, 8, 32>}, {transform_indices = @transform_3, window_bounds = array<i64: 1, 8, 32>}, {transform_indices = @transform_4, window_bounds = array<i64: 8, 8>}, {transform_indices = @transform_5, window_bounds = array<i64: 8, 8>}, {pipeline_mode = #tpu.pipeline_mode<synchronous>, transform_indices = @transform_6, window_bounds = array<i64: 8, 8>}, {transform_indices = @transform_7, window_bounds = array<i64: 8, 8>}, {pipeline_mode = #tpu.pipeline_mode<synchronous>, transform_indices = @transform_8, window_bounds = array<i64: 32, 32>}, {pipeline_mode = #tpu.pipeline_mode<synchronous>, transform_indices = @transform_9, window_bounds = array<i64: 1, 32>}, {pipeline_mode = #tpu.pipeline_mode<synchronous>, transform_indices = @transform_10, window_bounds = array<i64: 32, 32>}, {pipeline_mode = #tpu.pipeline_mode<synchronous>, transform_indices = @transform_11, window_bounds = array<i64: 1, 32>}, {pipeline_mode = #tpu.pipeline_mode<synchronous>, transform_indices = @transform_12, window_bounds = array<i64: 32, 32>}, {pipeline_mode = #tpu.pipeline_mode<synchronous>, transform_indices = @transform_13, window_bounds = array<i64: 1, 32>}, {pipeline_mode = #tpu.pipeline_mode<synchronous>, transform_indices = @transform_14, window_bounds = array<i64: 32, 32>}, {pipeline_mode = #tpu.pipeline_mode<synchronous>, transform_indices = @transform_15, window_bounds = array<i64: 1, 32>}, {pipeline_mode = #tpu.pipeline_mode<synchronous>, transform_indices = @transform_16, window_bounds = array<i64: 1, 32>}, {pipeline_mode = #tpu.pipeline_mode<synchronous>, transform_indices = @transform_17, window_bounds = array<i64: 1, 32>}, {pipeline_mode = #tpu.pipeline_mode<synchronous>, transform_indices = @transform_18, window_bounds = array<i64: 32, 64>}, {pipeline_mode = #tpu.pipeline_mode<synchronous>, transform_indices = @transform_19, window_bounds = array<i64: 1, 64>}, {pipeline_mode = #tpu.pipeline_mode<synchronous>, transform_indices = @transform_20, window_bounds = array<i64: 64, 32>}, {pipeline_mode = #tpu.pipeline_mode<synchronous>, transform_indices = @transform_21, window_bounds = array<i64: 1, 32>}, {pipeline_mode = #tpu.pipeline_mode<synchronous>, transform_indices = @transform_22, window_bounds = array<i64: 1, 32>}, {pipeline_mode = #tpu.pipeline_mode<synchronous>, transform_indices = @transform_23, window_bounds = array<i64: 1, 32>}, {transform_indices = @transform_24, window_bounds = array<i64: 1, 8, 32>}, {transform_indices = @transform_25, window_bounds = array<i64: 1, 4, 8, 8>}]} {
    %c0_i32 = arith.constant 0 : i32
    %0 = arith.cmpi eq, %arg1, %c0_i32 : i32
    %1 = arith.extui %0 : i1 to i32
    %c0_i32_0 = arith.constant 0 : i32
    %2 = arith.cmpi ne, %1, %c0_i32_0 : i32
    scf.if %2 {
      %c0_97 = arith.constant 0 : index
      %c0_98 = arith.constant 0 : index
      %c0_99 = arith.constant 0 : index
      %186 = vector.load %arg4[%c0_97, %c0_98, %c0_99] : memref<1x8x32xbf16, #tpu.memory_space<vmem>>, vector<1x8x32xbf16>
      %187 = vector.shape_cast %186 : vector<1x8x32xbf16> to vector<8x32xbf16>
      %c0_100 = arith.constant 0 : index
      %c0_101 = arith.constant 0 : index
      %188 = vector.load %arg12[%c0_100, %c0_101] : memref<32x32xbf16, #tpu.memory_space<vmem>>, vector<32x32xbf16>
      %cst_102 = arith.constant dense<0.000000e+00> : vector<8x32xf32>
      %189 = tpu.matmul %187, %188, %cst_102 {dimension_numbers = #tpu.dot_dimension_numbers<[1], [0], [0], [1], [0, 0, 1, 1], [], []>} : vector<8x32xbf16>, vector<32x32xbf16>, vector<8x32xf32> -> vector<8x32xf32>
      %c0_103 = arith.constant 0 : index
      %c0_104 = arith.constant 0 : index
      %190 = vector.load %arg13[%c0_103, %c0_104] : memref<1x32xf32, #tpu.memory_space<vmem>>, vector<1x32xf32>
      %191 = vector.broadcast %190 : vector<1x32xf32> to vector<8x32xf32>
      %192 = arith.addf %189, %191 : vector<8x32xf32>
      %c0_105 = arith.constant 0 : index
      %c0_106 = arith.constant 0 : index
      %c0_107 = arith.constant 0 : index
      %193 = vector.load %arg5[%c0_105, %c0_106, %c0_107] : memref<1x8x32xbf16, #tpu.memory_space<vmem>>, vector<1x8x32xbf16>
      %194 = vector.shape_cast %193 : vector<1x8x32xbf16> to vector<8x32xbf16>
      %c0_108 = arith.constant 0 : index
      %c0_109 = arith.constant 0 : index
      %195 = vector.load %arg14[%c0_108, %c0_109] : memref<32x32xbf16, #tpu.memory_space<vmem>>, vector<32x32xbf16>
      %cst_110 = arith.constant dense<0.000000e+00> : vector<8x32xf32>
      %196 = tpu.matmul %194, %195, %cst_110 {dimension_numbers = #tpu.dot_dimension_numbers<[1], [0], [0], [1], [0, 0, 1, 1], [], []>} : vector<8x32xbf16>, vector<32x32xbf16>, vector<8x32xf32> -> vector<8x32xf32>
      %c0_111 = arith.constant 0 : index
      %c0_112 = arith.constant 0 : index
      %197 = vector.load %arg15[%c0_111, %c0_112] : memref<1x32xf32, #tpu.memory_space<vmem>>, vector<1x32xf32>
      %198 = vector.broadcast %197 : vector<1x32xf32> to vector<8x32xf32>
      %199 = arith.addf %196, %198 : vector<8x32xf32>
      %200 = arith.truncf %192 : vector<8x32xf32> to vector<8x32xbf16>
      %201 = arith.truncf %199 : vector<8x32xf32> to vector<8x32xbf16>
      %202 = vector.extract_strided_slice %200 {offsets = [0, 0], sizes = [8, 8], strides = [1, 1]} : vector<8x32xbf16> to vector<8x8xbf16>
      %c0_113 = arith.constant 0 : index
      %c0_114 = arith.constant 0 : index
      %c0_115 = arith.constant 0 : index
      %203 = vector.load %arg28[%c0_113, %c0_114, %c0_115] : memref<4x8x8xbf16, #tpu.memory_space<vmem>>, vector<1x8x8xbf16>
      %204 = vector.shape_cast %203 : vector<1x8x8xbf16> to vector<8x8xbf16>
      %205 = vector.shape_cast %202 : vector<8x8xbf16> to vector<1x8x8xbf16>
      tpu.vector_store %arg28[%c0_113, %c0_114, %c0_115], %205 {strides = array<i32>} : memref<4x8x8xbf16, #tpu.memory_space<vmem>>, vector<1x8x8xbf16>,
      %206 = vector.extract_strided_slice %201 {offsets = [0, 0], sizes = [8, 8], strides = [1, 1]} : vector<8x32xbf16> to vector<8x8xbf16>
      %c0_116 = arith.constant 0 : index
      %c0_117 = arith.constant 0 : index
      %c0_118 = arith.constant 0 : index
      %207 = vector.load %arg29[%c0_116, %c0_117, %c0_118] : memref<4x8x8xbf16, #tpu.memory_space<vmem>>, vector<1x8x8xbf16>
      %208 = vector.shape_cast %207 : vector<1x8x8xbf16> to vector<8x8xbf16>
      %209 = vector.shape_cast %206 : vector<8x8xbf16> to vector<1x8x8xbf16>
      tpu.vector_store %arg29[%c0_116, %c0_117, %c0_118], %209 {strides = array<i32>} : memref<4x8x8xbf16, #tpu.memory_space<vmem>>, vector<1x8x8xbf16>,
      %210 = vector.extract_strided_slice %200 {offsets = [0, 8], sizes = [8, 8], strides = [1, 1]} : vector<8x32xbf16> to vector<8x8xbf16>
      %c1_119 = arith.constant 1 : index
      %c0_120 = arith.constant 0 : index
      %c0_121 = arith.constant 0 : index
      %211 = vector.load %arg28[%c1_119, %c0_120, %c0_121] : memref<4x8x8xbf16, #tpu.memory_space<vmem>>, vector<1x8x8xbf16>
      %212 = vector.shape_cast %211 : vector<1x8x8xbf16> to vector<8x8xbf16>
      %213 = vector.shape_cast %210 : vector<8x8xbf16> to vector<1x8x8xbf16>
      tpu.vector_store %arg28[%c1_119, %c0_120, %c0_121], %213 {strides = array<i32>} : memref<4x8x8xbf16, #tpu.memory_space<vmem>>, vector<1x8x8xbf16>,
      %214 = vector.extract_strided_slice %201 {offsets = [0, 8], sizes = [8, 8], strides = [1, 1]} : vector<8x32xbf16> to vector<8x8xbf16>
      %c1_122 = arith.constant 1 : index
      %c0_123 = arith.constant 0 : index
      %c0_124 = arith.constant 0 : index
      %215 = vector.load %arg29[%c1_122, %c0_123, %c0_124] : memref<4x8x8xbf16, #tpu.memory_space<vmem>>, vector<1x8x8xbf16>
      %216 = vector.shape_cast %215 : vector<1x8x8xbf16> to vector<8x8xbf16>
      %217 = vector.shape_cast %214 : vector<8x8xbf16> to vector<1x8x8xbf16>
      tpu.vector_store %arg29[%c1_122, %c0_123, %c0_124], %217 {strides = array<i32>} : memref<4x8x8xbf16, #tpu.memory_space<vmem>>, vector<1x8x8xbf16>,
      %218 = vector.extract_strided_slice %200 {offsets = [0, 16], sizes = [8, 8], strides = [1, 1]} : vector<8x32xbf16> to vector<8x8xbf16>
      %c2_125 = arith.constant 2 : index
      %c0_126 = arith.constant 0 : index
      %c0_127 = arith.constant 0 : index
      %219 = vector.load %arg28[%c2_125, %c0_126, %c0_127] : memref<4x8x8xbf16, #tpu.memory_space<vmem>>, vector<1x8x8xbf16>
      %220 = vector.shape_cast %219 : vector<1x8x8xbf16> to vector<8x8xbf16>
      %221 = vector.shape_cast %218 : vector<8x8xbf16> to vector<1x8x8xbf16>
      tpu.vector_store %arg28[%c2_125, %c0_126, %c0_127], %221 {strides = array<i32>} : memref<4x8x8xbf16, #tpu.memory_space<vmem>>, vector<1x8x8xbf16>,
      %222 = vector.extract_strided_slice %201 {offsets = [0, 16], sizes = [8, 8], strides = [1, 1]} : vector<8x32xbf16> to vector<8x8xbf16>
      %c2_128 = arith.constant 2 : index
      %c0_129 = arith.constant 0 : index
      %c0_130 = arith.constant 0 : index
      %223 = vector.load %arg29[%c2_128, %c0_129, %c0_130] : memref<4x8x8xbf16, #tpu.memory_space<vmem>>, vector<1x8x8xbf16>
      %224 = vector.shape_cast %223 : vector<1x8x8xbf16> to vector<8x8xbf16>
      %225 = vector.shape_cast %222 : vector<8x8xbf16> to vector<1x8x8xbf16>
      tpu.vector_store %arg29[%c2_128, %c0_129, %c0_130], %225 {strides = array<i32>} : memref<4x8x8xbf16, #tpu.memory_space<vmem>>, vector<1x8x8xbf16>,
      %226 = vector.extract_strided_slice %200 {offsets = [0, 24], sizes = [8, 8], strides = [1, 1]} : vector<8x32xbf16> to vector<8x8xbf16>
      %c3_131 = arith.constant 3 : index
      %c0_132 = arith.constant 0 : index
      %c0_133 = arith.constant 0 : index
      %227 = vector.load %arg28[%c3_131, %c0_132, %c0_133] : memref<4x8x8xbf16, #tpu.memory_space<vmem>>, vector<1x8x8xbf16>
      %228 = vector.shape_cast %227 : vector<1x8x8xbf16> to vector<8x8xbf16>
      %229 = vector.shape_cast %226 : vector<8x8xbf16> to vector<1x8x8xbf16>
      tpu.vector_store %arg28[%c3_131, %c0_132, %c0_133], %229 {strides = array<i32>} : memref<4x8x8xbf16, #tpu.memory_space<vmem>>, vector<1x8x8xbf16>,
      %230 = vector.extract_strided_slice %201 {offsets = [0, 24], sizes = [8, 8], strides = [1, 1]} : vector<8x32xbf16> to vector<8x8xbf16>
      %c3_134 = arith.constant 3 : index
      %c0_135 = arith.constant 0 : index
      %c0_136 = arith.constant 0 : index
      %231 = vector.load %arg29[%c3_134, %c0_135, %c0_136] : memref<4x8x8xbf16, #tpu.memory_space<vmem>>, vector<1x8x8xbf16>
      %232 = vector.shape_cast %231 : vector<1x8x8xbf16> to vector<8x8xbf16>
      %233 = vector.shape_cast %230 : vector<8x8xbf16> to vector<1x8x8xbf16>
      tpu.vector_store %arg29[%c3_134, %c0_135, %c0_136], %233 {strides = array<i32>} : memref<4x8x8xbf16, #tpu.memory_space<vmem>>, vector<1x8x8xbf16>,
    } else {
    }
    %c0 = arith.constant 0 : index
    %c0_1 = arith.constant 0 : index
    %c0_2 = arith.constant 0 : index
    %3 = vector.load %arg3[%c0, %c0_1, %c0_2] : memref<1x8x32xf32, #tpu.memory_space<vmem>>, vector<1x8x32xf32>
    %4 = vector.shape_cast %3 : vector<1x8x32xf32> to vector<8x32xf32>
    %5 = arith.truncf %4 : vector<8x32xf32> to vector<8x32xbf16>
    %c0_3 = arith.constant 0 : index
    %c0_4 = arith.constant 0 : index
    %6 = vector.load %arg10[%c0_3, %c0_4] : memref<32x32xbf16, #tpu.memory_space<vmem>>, vector<32x32xbf16>
    %cst = arith.constant dense<0.000000e+00> : vector<8x32xf32>
    %7 = tpu.matmul %5, %6, %cst {dimension_numbers = #tpu.dot_dimension_numbers<[1], [0], [0], [1], [0, 0, 1, 1], [], []>} : vector<8x32xbf16>, vector<32x32xbf16>, vector<8x32xf32> -> vector<8x32xf32>
    %c0_5 = arith.constant 0 : index
    %c0_6 = arith.constant 0 : index
    %8 = vector.load %arg11[%c0_5, %c0_6] : memref<1x32xf32, #tpu.memory_space<vmem>>, vector<1x32xf32>
    %9 = vector.broadcast %8 : vector<1x32xf32> to vector<8x32xf32>
    %10 = arith.addf %7, %9 : vector<8x32xf32>
    %cst_7 = arith.constant 0.353553385 : f32
    %11 = vector.broadcast %cst_7 : f32 to vector<8x32xf32>
    %12 = arith.mulf %10, %11 : vector<8x32xf32>
    %13 = arith.truncf %12 : vector<8x32xf32> to vector<8x32xbf16>
    %14 = vector.extract_strided_slice %13 {offsets = [0, 0], sizes = [8, 8], strides = [1, 1]} : vector<8x32xbf16> to vector<8x8xbf16>
    %c0_8 = arith.constant 0 : index
    %c0_9 = arith.constant 0 : index
    %c0_10 = arith.constant 0 : index
    %15 = vector.load %arg30[%c0_8, %c0_9, %c0_10] : memref<4x8x8xbf16, #tpu.memory_space<vmem>>, vector<1x8x8xbf16>
    %16 = vector.shape_cast %15 : vector<1x8x8xbf16> to vector<8x8xbf16>
    %17 = vector.shape_cast %14 : vector<8x8xbf16> to vector<1x8x8xbf16>
    tpu.vector_store %arg30[%c0_8, %c0_9, %c0_10], %17 {strides = array<i32>} : memref<4x8x8xbf16, #tpu.memory_space<vmem>>, vector<1x8x8xbf16>,
    %18 = vector.extract_strided_slice %13 {offsets = [0, 8], sizes = [8, 8], strides = [1, 1]} : vector<8x32xbf16> to vector<8x8xbf16>
    %c1 = arith.constant 1 : index
    %c0_11 = arith.constant 0 : index
    %c0_12 = arith.constant 0 : index
    %19 = vector.load %arg30[%c1, %c0_11, %c0_12] : memref<4x8x8xbf16, #tpu.memory_space<vmem>>, vector<1x8x8xbf16>
    %20 = vector.shape_cast %19 : vector<1x8x8xbf16> to vector<8x8xbf16>
    %21 = vector.shape_cast %18 : vector<8x8xbf16> to vector<1x8x8xbf16>
    tpu.vector_store %arg30[%c1, %c0_11, %c0_12], %21 {strides = array<i32>} : memref<4x8x8xbf16, #tpu.memory_space<vmem>>, vector<1x8x8xbf16>,
    %22 = vector.extract_strided_slice %13 {offsets = [0, 16], sizes = [8, 8], strides = [1, 1]} : vector<8x32xbf16> to vector<8x8xbf16>
    %c2 = arith.constant 2 : index
    %c0_13 = arith.constant 0 : index
    %c0_14 = arith.constant 0 : index
    %23 = vector.load %arg30[%c2, %c0_13, %c0_14] : memref<4x8x8xbf16, #tpu.memory_space<vmem>>, vector<1x8x8xbf16>
    %24 = vector.shape_cast %23 : vector<1x8x8xbf16> to vector<8x8xbf16>
    %25 = vector.shape_cast %22 : vector<8x8xbf16> to vector<1x8x8xbf16>
    tpu.vector_store %arg30[%c2, %c0_13, %c0_14], %25 {strides = array<i32>} : memref<4x8x8xbf16, #tpu.memory_space<vmem>>, vector<1x8x8xbf16>,
    %26 = vector.extract_strided_slice %13 {offsets = [0, 24], sizes = [8, 8], strides = [1, 1]} : vector<8x32xbf16> to vector<8x8xbf16>
    %c3 = arith.constant 3 : index
    %c0_15 = arith.constant 0 : index
    %c0_16 = arith.constant 0 : index
    %27 = vector.load %arg30[%c3, %c0_15, %c0_16] : memref<4x8x8xbf16, #tpu.memory_space<vmem>>, vector<1x8x8xbf16>
    %28 = vector.shape_cast %27 : vector<1x8x8xbf16> to vector<8x8xbf16>
    %29 = vector.shape_cast %26 : vector<8x8xbf16> to vector<1x8x8xbf16>
    tpu.vector_store %arg30[%c3, %c0_15, %c0_16], %29 {strides = array<i32>} : memref<4x8x8xbf16, #tpu.memory_space<vmem>>, vector<1x8x8xbf16>,
    %c0_17 = arith.constant 0 : index
    %c0_18 = arith.constant 0 : index
    %c0_19 = arith.constant 0 : index
    %30 = vector.load %arg30[%c0_17, %c0_18, %c0_19] : memref<4x8x8xbf16, #tpu.memory_space<vmem>>, vector<4x8x8xbf16>
    %c0_20 = arith.constant 0 : index
    %c0_21 = arith.constant 0 : index
    %c0_22 = arith.constant 0 : index
    %31 = vector.load %arg28[%c0_20, %c0_21, %c0_22] : memref<4x8x8xbf16, #tpu.memory_space<vmem>>, vector<4x8x8xbf16>
    %c0_23 = arith.constant 0 : index
    %c0_24 = arith.constant 0 : index
    %c0_25 = arith.constant 0 : index
    %32 = vector.load %arg29[%c0_23, %c0_24, %c0_25] : memref<4x8x8xbf16, #tpu.memory_space<vmem>>, vector<4x8x8xbf16>
    "tpu.trace_start"() <{level = 10 : i32, message = "hqd,hkd->hqk"}> : () -> ()
    %cst_26 = arith.constant dense<0.000000e+00> : vector<4x8x8xf32>
    %33 = tpu.matmul %30, %31, %cst_26 {dimension_numbers = #tpu.dot_dimension_numbers<[2], [2], [1], [1], [0, 0, 0, 1, 1, 1], [0], [0]>} : vector<4x8x8xbf16>, vector<4x8x8xbf16>, vector<4x8x8xf32> -> vector<4x8x8xf32>
    "tpu.trace_stop"() : () -> ()
    %c0_27 = arith.constant 0 : index
    %c0_28 = arith.constant 0 : index
    %34 = vector.load %arg6[%c0_27, %c0_28] : memref<8x8xf32, #tpu.memory_space<vmem>>, vector<8x8xf32>
    %c0_29 = arith.constant 0 : index
    %c0_30 = arith.constant 0 : index
    %35 = vector.load %arg7[%c0_29, %c0_30] : memref<8x8xf32, #tpu.memory_space<vmem>>, vector<8x8xf32>
    %c0_31 = arith.constant 0 : index
    %c0_32 = arith.constant 0 : index
    %36 = vector.load %arg9[%c0_31, %c0_32] : memref<8x8xf32, #tpu.memory_space<vmem>>, vector<8x8xf32>
    %37 = vector.shape_cast %34 : vector<8x8xf32> to vector<1x8x8xf32>
    %38 = vector.broadcast %37 : vector<1x8x8xf32> to vector<4x8x8xf32>
    %39 = arith.addf %33, %38 : vector<4x8x8xf32>
    %cst_33 = arith.constant dense<0xFF800000> : vector<4x8xf32>
    %40 = vector.multi_reduction <maximumf>, %39, %cst_33 [2] : vector<4x8x8xf32> to vector<4x8xf32>
    %41 = vector.shape_cast %40 : vector<4x8xf32> to vector<4x8x1xf32>
    %42 = vector.broadcast %41 : vector<4x8x1xf32> to vector<4x8x8xf32>
    %43 = arith.subf %39, %42 : vector<4x8x8xf32>
    %44 = math.exp %43 : vector<4x8x8xf32>
    %cst_34 = arith.constant dense<0.000000e+00> : vector<4x8xf32>
    %45 = vector.multi_reduction <add>, %44, %cst_34 [2] : vector<4x8x8xf32> to vector<4x8xf32>
    %46 = vector.shape_cast %45 : vector<4x8xf32> to vector<4x8x1xf32>
    %47 = vector.broadcast %46 : vector<4x8x1xf32> to vector<4x8x8xf32>
    %48 = arith.divf %44, %47 : vector<4x8x8xf32>
    %49 = vector.shape_cast %35 : vector<8x8xf32> to vector<1x8x8xf32>
    %50 = vector.broadcast %49 : vector<1x8x8xf32> to vector<4x8x8xf32>
    %51 = arith.mulf %48, %50 : vector<4x8x8xf32>
    %52 = vector.shape_cast %51 : vector<4x8x8xf32> to vector<32x8xf32>
    %53 = arith.truncf %52 : vector<32x8xf32> to vector<32x8xbf16>
    %c0_35 = arith.constant 0 : index
    %c0_36 = arith.constant 0 : index
    %54 = vector.load %arg8[%c0_35, %c0_36] : memref<8x8xbf16, #tpu.memory_space<vmem>>, vector<8x8xbf16>
    %cst_37 = arith.constant dense<0.000000e+00> : vector<32x8xf32>
    %55 = tpu.matmul %53, %54, %cst_37 {dimension_numbers = #tpu.dot_dimension_numbers<[1], [0], [0], [1], [0, 0, 1, 1], [], []>} : vector<32x8xbf16>, vector<8x8xbf16>, vector<32x8xf32> -> vector<32x8xf32>
    %56 = vector.shape_cast %55 : vector<32x8xf32> to vector<4x8x8xf32>
    %57 = vector.shape_cast %36 : vector<8x8xf32> to vector<1x8x8xf32>
    %58 = vector.broadcast %57 : vector<1x8x8xf32> to vector<4x8x8xf32>
    %59 = arith.mulf %56, %58 : vector<4x8x8xf32>
    %cst_38 = arith.constant 0.000000e+00 : f32
    %60 = vector.broadcast %cst_38 : f32 to vector<4x8x8xf32>
    %61 = arith.maximumf %59, %60 : vector<4x8x8xf32>
    %62 = math.sqrt %61 : vector<4x8x8xf32>
    %c0_39 = arith.constant 0 : index
    %c0_40 = arith.constant 0 : index
    %c0_41 = arith.constant 0 : index
    %63 = vector.load %arg2[%c0_39, %c0_40, %c0_41] : memref<4x1x1xf32, #tpu.memory_space<vmem>>, vector<4x1x1xf32>
    %64 = vector.broadcast %63 : vector<4x1x1xf32> to vector<4x8x8xf32>
    %65 = arith.mulf %62, %64 : vector<4x8x8xf32>
    %66 = math.exp %65 : vector<4x8x8xf32>
    %cst_42 = arith.constant 9.99999974E-6 : f32
    %cst_43 = arith.constant 1.000000e+05 : f32
    %67 = vector.broadcast %cst_42 : f32 to vector<4x8x8xf32>
    %68 = arith.maximumf %67, %66 : vector<4x8x8xf32>
    %69 = vector.broadcast %cst_43 : f32 to vector<4x8x8xf32>
    %70 = arith.minimumf %69, %68 : vector<4x8x8xf32>
    %71 = arith.mulf %33, %70 : vector<4x8x8xf32>
    %72 = vector.shape_cast %34 : vector<8x8xf32> to vector<1x8x8xf32>
    %73 = vector.broadcast %72 : vector<1x8x8xf32> to vector<4x8x8xf32>
    %74 = arith.addf %71, %73 : vector<4x8x8xf32>
    %cst_44 = arith.constant dense<0xFF800000> : vector<4x8xf32>
    %75 = vector.multi_reduction <maximumf>, %74, %cst_44 [2] : vector<4x8x8xf32> to vector<4x8xf32>
    %76 = vector.shape_cast %75 : vector<4x8xf32> to vector<4x8x1xf32>
    %77 = vector.broadcast %76 : vector<4x8x1xf32> to vector<4x8x8xf32>
    %78 = arith.subf %74, %77 : vector<4x8x8xf32>
    %79 = math.exp %78 : vector<4x8x8xf32>
    %cst_45 = arith.constant dense<0.000000e+00> : vector<4x8xf32>
    %80 = vector.multi_reduction <add>, %79, %cst_45 [2] : vector<4x8x8xf32> to vector<4x8xf32>
    %81 = vector.shape_cast %80 : vector<4x8xf32> to vector<4x8x1xf32>
    %82 = tpu.reciprocal %81 {approx = true} : vector<4x8x1xf32> -> vector<4x8x1xf32>
    %83 = vector.broadcast %82 : vector<4x8x1xf32> to vector<4x8x8xf32>
    %84 = arith.mulf %79, %83 : vector<4x8x8xf32>
    %85 = arith.truncf %84 : vector<4x8x8xf32> to vector<4x8x8xbf16>
    %c0_46 = arith.constant 0 : index
    %c0_47 = arith.constant 0 : index
    %c0_48 = arith.constant 0 : index
    %c0_49 = arith.constant 0 : index
    %86 = vector.load %arg27[%c0_46, %c0_47, %c0_48, %c0_49] : memref<1x4x8x8xbf16, #tpu.memory_space<vmem>>, vector<1x4x8x8xbf16>
    %87 = vector.shape_cast %86 : vector<1x4x8x8xbf16> to vector<4x8x8xbf16>
    %88 = vector.shape_cast %85 : vector<4x8x8xbf16> to vector<1x4x8x8xbf16>
    tpu.vector_store %arg27[%c0_46, %c0_47, %c0_48, %c0_49], %88 {strides = array<i32>} : memref<1x4x8x8xbf16, #tpu.memory_space<vmem>>, vector<1x4x8x8xbf16>,
    %89 = arith.truncf %84 : vector<4x8x8xf32> to vector<4x8x8xbf16>
    "tpu.trace_start"() <{level = 10 : i32, message = "hqk,hkd->hqd"}> : () -> ()
    %cst_50 = arith.constant dense<0.000000e+00> : vector<4x8x8xf32>
    %90 = tpu.matmul %89, %32, %cst_50 {dimension_numbers = #tpu.dot_dimension_numbers<[2], [1], [1], [2], [0, 0, 0, 1, 1, 2], [0], [0]>} : vector<4x8x8xbf16>, vector<4x8x8xbf16>, vector<4x8x8xf32> -> vector<4x8x8xf32>
    "tpu.trace_stop"() : () -> ()
    %91 = vector.extract_strided_slice %90 {offsets = [0, 0, 0], sizes = [1, 8, 8], strides = [1, 1, 1]} : vector<4x8x8xf32> to vector<1x8x8xf32>
    %92 = vector.shape_cast %91 : vector<1x8x8xf32> to vector<8x8xf32>
    %93 = arith.truncf %92 : vector<8x8xf32> to vector<8x8xbf16>
    %c0_51 = arith.constant 0 : index
    %c0_52 = arith.constant 0 : index
    %94 = vector.load %arg31[%c0_51, %c0_52] : memref<8x32xbf16, #tpu.memory_space<vmem>>, vector<8x8xbf16>
    tpu.vector_store %arg31[%c0_51, %c0_52], %93 {strides = array<i32>} : memref<8x32xbf16, #tpu.memory_space<vmem>>, vector<8x8xbf16>,
    %95 = vector.extract_strided_slice %90 {offsets = [1, 0, 0], sizes = [1, 8, 8], strides = [1, 1, 1]} : vector<4x8x8xf32> to vector<1x8x8xf32>
    %96 = vector.shape_cast %95 : vector<1x8x8xf32> to vector<8x8xf32>
    %97 = arith.truncf %96 : vector<8x8xf32> to vector<8x8xbf16>
    %c0_53 = arith.constant 0 : index
    %c8 = arith.constant 8 : index
    %98 = vector.load %arg31[%c0_53, %c8] : memref<8x32xbf16, #tpu.memory_space<vmem>>, vector<8x8xbf16>
    tpu.vector_store %arg31[%c0_53, %c8], %97 {strides = array<i32>} : memref<8x32xbf16, #tpu.memory_space<vmem>>, vector<8x8xbf16>,
    %99 = vector.extract_strided_slice %90 {offsets = [2, 0, 0], sizes = [1, 8, 8], strides = [1, 1, 1]} : vector<4x8x8xf32> to vector<1x8x8xf32>
    %100 = vector.shape_cast %99 : vector<1x8x8xf32> to vector<8x8xf32>
    %101 = arith.truncf %100 : vector<8x8xf32> to vector<8x8xbf16>
    %c0_54 = arith.constant 0 : index
    %c16 = arith.constant 16 : index
    %102 = vector.load %arg31[%c0_54, %c16] : memref<8x32xbf16, #tpu.memory_space<vmem>>, vector<8x8xbf16>
    tpu.vector_store %arg31[%c0_54, %c16], %101 {strides = array<i32>} : memref<8x32xbf16, #tpu.memory_space<vmem>>, vector<8x8xbf16>,
    %103 = vector.extract_strided_slice %90 {offsets = [3, 0, 0], sizes = [1, 8, 8], strides = [1, 1, 1]} : vector<4x8x8xf32> to vector<1x8x8xf32>
    %104 = vector.shape_cast %103 : vector<1x8x8xf32> to vector<8x8xf32>
    %105 = arith.truncf %104 : vector<8x8xf32> to vector<8x8xbf16>
    %c0_55 = arith.constant 0 : index
    %c24 = arith.constant 24 : index
    %106 = vector.load %arg31[%c0_55, %c24] : memref<8x32xbf16, #tpu.memory_space<vmem>>, vector<8x8xbf16>
    tpu.vector_store %arg31[%c0_55, %c24], %105 {strides = array<i32>} : memref<8x32xbf16, #tpu.memory_space<vmem>>, vector<8x8xbf16>,
    %c0_56 = arith.constant 0 : index
    %c0_57 = arith.constant 0 : index
    %107 = vector.load %arg31[%c0_56, %c0_57] : memref<8x32xbf16, #tpu.memory_space<vmem>>, vector<8x32xbf16>
    %c0_58 = arith.constant 0 : index
    %c0_59 = arith.constant 0 : index
    %108 = vector.load %arg16[%c0_58, %c0_59] : memref<32x32xbf16, #tpu.memory_space<vmem>>, vector<32x32xbf16>
    %cst_60 = arith.constant dense<0.000000e+00> : vector<8x32xf32>
    %109 = tpu.matmul %107, %108, %cst_60 {dimension_numbers = #tpu.dot_dimension_numbers<[1], [0], [0], [1], [0, 0, 1, 1], [], []>} : vector<8x32xbf16>, vector<32x32xbf16>, vector<8x32xf32> -> vector<8x32xf32>
    %c0_61 = arith.constant 0 : index
    %c0_62 = arith.constant 0 : index
    %110 = vector.load %arg17[%c0_61, %c0_62] : memref<1x32xf32, #tpu.memory_space<vmem>>, vector<1x32xf32>
    %111 = vector.broadcast %110 : vector<1x32xf32> to vector<8x32xf32>
    %112 = arith.addf %109, %111 : vector<8x32xf32>
    %113 = arith.addf %4, %112 : vector<8x32xf32>
    %c0_63 = arith.constant 0 : index
    %c0_64 = arith.constant 0 : index
    %114 = vector.load %arg18[%c0_63, %c0_64] : memref<1x32xf32, #tpu.memory_space<vmem>>, vector<1x32xf32>
    %c0_65 = arith.constant 0 : index
    %c0_66 = arith.constant 0 : index
    %115 = vector.load %arg19[%c0_65, %c0_66] : memref<1x32xf32, #tpu.memory_space<vmem>>, vector<1x32xf32>
    %cst_67 = arith.constant dense<0.000000e+00> : vector<8xf32>
    %116 = vector.multi_reduction <add>, %113, %cst_67 [1] : vector<8x32xf32> to vector<8xf32>
    %117 = vector.shape_cast %116 : vector<8xf32> to vector<8x1xf32>
    %cst_68 = arith.constant 3.200000e+01 : f32
    %118 = vector.broadcast %cst_68 : f32 to vector<8x1xf32>
    %119 = arith.divf %117, %118 : vector<8x1xf32>
    %120 = vector.broadcast %119 : vector<8x1xf32> to vector<8x32xf32>
    %121 = arith.subf %113, %120 : vector<8x32xf32>
    %122 = arith.mulf %121, %121 : vector<8x32xf32>
    %cst_69 = arith.constant dense<0.000000e+00> : vector<8xf32>
    %123 = vector.multi_reduction <add>, %122, %cst_69 [1] : vector<8x32xf32> to vector<8xf32>
    %124 = vector.shape_cast %123 : vector<8xf32> to vector<8x1xf32>
    %cst_70 = arith.constant 3.200000e+01 : f32
    %125 = vector.broadcast %cst_70 : f32 to vector<8x1xf32>
    %126 = arith.divf %124, %125 : vector<8x1xf32>
    %127 = vector.broadcast %119 : vector<8x1xf32> to vector<8x32xf32>
    %128 = arith.subf %113, %127 : vector<8x32xf32>
    %cst_71 = arith.constant 9.99999974E-6 : f32
    %129 = vector.broadcast %cst_71 : f32 to vector<8x1xf32>
    %130 = arith.addf %126, %129 : vector<8x1xf32>
    %131 = math.rsqrt %130 : vector<8x1xf32>
    %132 = vector.broadcast %131 : vector<8x1xf32> to vector<8x32xf32>
    %133 = arith.mulf %128, %132 : vector<8x32xf32>
    %134 = vector.broadcast %114 : vector<1x32xf32> to vector<8x32xf32>
    %135 = arith.mulf %133, %134 : vector<8x32xf32>
    %136 = vector.broadcast %115 : vector<1x32xf32> to vector<8x32xf32>
    %137 = arith.addf %135, %136 : vector<8x32xf32>
    %138 = arith.truncf %137 : vector<8x32xf32> to vector<8x32xbf16>
    %c0_72 = arith.constant 0 : index
    %c0_73 = arith.constant 0 : index
    %139 = vector.load %arg20[%c0_72, %c0_73] : memref<32x64xbf16, #tpu.memory_space<vmem>>, vector<32x64xbf16>
    %cst_74 = arith.constant dense<0.000000e+00> : vector<8x64xf32>
    %140 = tpu.matmul %138, %139, %cst_74 {dimension_numbers = #tpu.dot_dimension_numbers<[1], [0], [0], [1], [0, 0, 1, 1], [], []>} : vector<8x32xbf16>, vector<32x64xbf16>, vector<8x64xf32> -> vector<8x64xf32>
    %c0_75 = arith.constant 0 : index
    %c0_76 = arith.constant 0 : index
    %141 = vector.load %arg21[%c0_75, %c0_76] : memref<1x64xf32, #tpu.memory_space<vmem>>, vector<1x64xf32>
    %142 = vector.broadcast %141 : vector<1x64xf32> to vector<8x64xf32>
    %143 = arith.addf %140, %142 : vector<8x64xf32>
    %cst_77 = arith.constant 5.000000e-01 : f32
    %144 = vector.broadcast %cst_77 : f32 to vector<8x64xf32>
    %145 = arith.mulf %144, %143 : vector<8x64xf32>
    %cst_78 = arith.constant 0.707106769 : f32
    %146 = vector.broadcast %cst_78 : f32 to vector<8x64xf32>
    %147 = arith.mulf %143, %146 : vector<8x64xf32>
    %148 = math.erf %147 : vector<8x64xf32>
    %cst_79 = arith.constant 1.000000e+00 : f32
    %149 = vector.broadcast %cst_79 : f32 to vector<8x64xf32>
    %150 = arith.addf %149, %148 : vector<8x64xf32>
    %151 = arith.mulf %145, %150 : vector<8x64xf32>
    %152 = arith.truncf %151 : vector<8x64xf32> to vector<8x64xbf16>
    %c0_80 = arith.constant 0 : index
    %c0_81 = arith.constant 0 : index
    %153 = vector.load %arg22[%c0_80, %c0_81] : memref<64x32xbf16, #tpu.memory_space<vmem>>, vector<64x32xbf16>
    %cst_82 = arith.constant dense<0.000000e+00> : vector<8x32xf32>
    %154 = tpu.matmul %152, %153, %cst_82 {dimension_numbers = #tpu.dot_dimension_numbers<[1], [0], [0], [1], [0, 0, 1, 1], [], []>} : vector<8x64xbf16>, vector<64x32xbf16>, vector<8x32xf32> -> vector<8x32xf32>
    %c0_83 = arith.constant 0 : index
    %c0_84 = arith.constant 0 : index
    %155 = vector.load %arg23[%c0_83, %c0_84] : memref<1x32xf32, #tpu.memory_space<vmem>>, vector<1x32xf32>
    %156 = vector.broadcast %155 : vector<1x32xf32> to vector<8x32xf32>
    %157 = arith.addf %154, %156 : vector<8x32xf32>
    %158 = arith.addf %137, %157 : vector<8x32xf32>
    %c0_85 = arith.constant 0 : index
    %c0_86 = arith.constant 0 : index
    %159 = vector.load %arg24[%c0_85, %c0_86] : memref<1x32xf32, #tpu.memory_space<vmem>>, vector<1x32xf32>
    %c0_87 = arith.constant 0 : index
    %c0_88 = arith.constant 0 : index
    %160 = vector.load %arg25[%c0_87, %c0_88] : memref<1x32xf32, #tpu.memory_space<vmem>>, vector<1x32xf32>
    %cst_89 = arith.constant dense<0.000000e+00> : vector<8xf32>
    %161 = vector.multi_reduction <add>, %158, %cst_89 [1] : vector<8x32xf32> to vector<8xf32>
    %162 = vector.shape_cast %161 : vector<8xf32> to vector<8x1xf32>
    %cst_90 = arith.constant 3.200000e+01 : f32
    %163 = vector.broadcast %cst_90 : f32 to vector<8x1xf32>
    %164 = arith.divf %162, %163 : vector<8x1xf32>
    %165 = vector.broadcast %164 : vector<8x1xf32> to vector<8x32xf32>
    %166 = arith.subf %158, %165 : vector<8x32xf32>
    %167 = arith.mulf %166, %166 : vector<8x32xf32>
    %cst_91 = arith.constant dense<0.000000e+00> : vector<8xf32>
    %168 = vector.multi_reduction <add>, %167, %cst_91 [1] : vector<8x32xf32> to vector<8xf32>
    %169 = vector.shape_cast %168 : vector<8xf32> to vector<8x1xf32>
    %cst_92 = arith.constant 3.200000e+01 : f32
    %170 = vector.broadcast %cst_92 : f32 to vector<8x1xf32>
    %171 = arith.divf %169, %170 : vector<8x1xf32>
    %172 = vector.broadcast %164 : vector<8x1xf32> to vector<8x32xf32>
    %173 = arith.subf %158, %172 : vector<8x32xf32>
    %cst_93 = arith.constant 9.99999974E-6 : f32
    %174 = vector.broadcast %cst_93 : f32 to vector<8x1xf32>
    %175 = arith.addf %171, %174 : vector<8x1xf32>
    %176 = math.rsqrt %175 : vector<8x1xf32>
    %177 = vector.broadcast %176 : vector<8x1xf32> to vector<8x32xf32>
    %178 = arith.mulf %173, %177 : vector<8x32xf32>
    %179 = vector.broadcast %159 : vector<1x32xf32> to vector<8x32xf32>
    %180 = arith.mulf %178, %179 : vector<8x32xf32>
    %181 = vector.broadcast %160 : vector<1x32xf32> to vector<8x32xf32>
    %182 = arith.addf %180, %181 : vector<8x32xf32>
    %c0_94 = arith.constant 0 : index
    %c0_95 = arith.constant 0 : index
    %c0_96 = arith.constant 0 : index
    %183 = vector.load %arg26[%c0_94, %c0_95, %c0_96] : memref<1x8x32xf32, #tpu.memory_space<vmem>>, vector<1x8x32xf32>
    %184 = vector.shape_cast %183 : vector<1x8x32xf32> to vector<8x32xf32>
    %185 = vector.shape_cast %182 : vector<8x32xf32> to vector<1x8x32xf32>
    tpu.vector_store %arg26[%c0_94, %c0_95, %c0_96], %185 {strides = array<i32>} : memref<1x8x32xf32, #tpu.memory_space<vmem>>, vector<1x8x32xf32>,
    return
  }
  func.func @transform_0(%arg0: i32, %arg1: i32) -> (i32, i32, i32) {
    %c0_i32 = arith.constant 0 : i32
    %c0_i32_0 = arith.constant 0 : i32
    %c0_i32_1 = arith.constant 0 : i32
    %c0_i32_2 = arith.constant 0 : i32
    return %c0_i32, %c0_i32_0, %c0_i32_1 : i32, i32, i32
  }
  func.func @transform_1(%arg0: i32, %arg1: i32) -> (i32, i32, i32) {
    %c0_i32 = arith.constant 0 : i32
    %c0_i32_0 = arith.constant 0 : i32
    return %arg0, %arg1, %c0_i32 : i32, i32, i32
  }
  func.func @transform_2(%arg0: i32, %arg1: i32) -> (i32, i32, i32) {
    %c0_i32 = arith.constant 0 : i32
    %c0_i32_0 = arith.constant 0 : i32
    %c0_i32_1 = arith.constant 0 : i32
    return %arg0, %c0_i32, %c0_i32_0 : i32, i32, i32
  }
  func.func @transform_3(%arg0: i32, %arg1: i32) -> (i32, i32, i32) {
    %c0_i32 = arith.constant 0 : i32
    %c0_i32_0 = arith.constant 0 : i32
    %c0_i32_1 = arith.constant 0 : i32
    return %arg0, %c0_i32, %c0_i32_0 : i32, i32, i32
  }
  func.func @transform_4(%arg0: i32, %arg1: i32) -> (i32, i32) {
    %c0_i32 = arith.constant 0 : i32
    %c0_i32_0 = arith.constant 0 : i32
    return %arg1, %c0_i32 : i32, i32
  }
  func.func @transform_5(%arg0: i32, %arg1: i32) -> (i32, i32) {
    %c0_i32 = arith.constant 0 : i32
    %c0_i32_0 = arith.constant 0 : i32
    return %arg1, %c0_i32 : i32, i32
  }
  func.func @transform_6(%arg0: i32, %arg1: i32) -> (i32, i32) {
    %c0_i32 = arith.constant 0 : i32
    %c0_i32_0 = arith.constant 0 : i32
    %c0_i32_1 = arith.constant 0 : i32
    return %c0_i32, %c0_i32_0 : i32, i32
  }
  func.func @transform_7(%arg0: i32, %arg1: i32) -> (i32, i32) {
    %c0_i32 = arith.constant 0 : i32
    %c0_i32_0 = arith.constant 0 : i32
    return %arg1, %c0_i32 : i32, i32
  }
  func.func @transform_8(%arg0: i32, %arg1: i32) -> (i32, i32) {
    %c0_i32 = arith.constant 0 : i32
    %c0_i32_0 = arith.constant 0 : i32
    %c0_i32_1 = arith.constant 0 : i32
    return %c0_i32, %c0_i32_0 : i32, i32
  }
  func.func @transform_9(%arg0: i32, %arg1: i32) -> (i32, i32) {
    %c0_i32 = arith.constant 0 : i32
    %c0_i32_0 = arith.constant 0 : i32
    %c0_i32_1 = arith.constant 0 : i32
    return %c0_i32, %c0_i32_0 : i32, i32
  }
  func.func @transform_10(%arg0: i32, %arg1: i32) -> (i32, i32) {
    %c0_i32 = arith.constant 0 : i32
    %c0_i32_0 = arith.constant 0 : i32
    %c0_i32_1 = arith.constant 0 : i32
    return %c0_i32, %c0_i32_0 : i32, i32
  }
  func.func @transform_11(%arg0: i32, %arg1: i32) -> (i32, i32) {
    %c0_i32 = arith.constant 0 : i32
    %c0_i32_0 = arith.constant 0 : i32
    %c0_i32_1 = arith.constant 0 : i32
    return %c0_i32, %c0_i32_0 : i32, i32
  }
  func.func @transform_12(%arg0: i32, %arg1: i32) -> (i32, i32) {
    %c0_i32 = arith.constant 0 : i32
    %c0_i32_0 = arith.constant 0 : i32
    %c0_i32_1 = arith.constant 0 : i32
    return %c0_i32, %c0_i32_0 : i32, i32
  }
  func.func @transform_13(%arg0: i32, %arg1: i32) -> (i32, i32) {
    %c0_i32 = arith.constant 0 : i32
    %c0_i32_0 = arith.constant 0 : i32
    %c0_i32_1 = arith.constant 0 : i32
    return %c0_i32, %c0_i32_0 : i32, i32
  }
  func.func @transform_14(%arg0: i32, %arg1: i32) -> (i32, i32) {
    %c0_i32 = arith.constant 0 : i32
    %c0_i32_0 = arith.constant 0 : i32
    %c0_i32_1 = arith.constant 0 : i32
    return %c0_i32, %c0_i32_0 : i32, i32
  }
  func.func @transform_15(%arg0: i32, %arg1: i32) -> (i32, i32) {
    %c0_i32 = arith.constant 0 : i32
    %c0_i32_0 = arith.constant 0 : i32
    %c0_i32_1 = arith.constant 0 : i32
    return %c0_i32, %c0_i32_0 : i32, i32
  }
  func.func @transform_16(%arg0: i32, %arg1: i32) -> (i32, i32) {
    %c0_i32 = arith.constant 0 : i32
    %c0_i32_0 = arith.constant 0 : i32
    %c0_i32_1 = arith.constant 0 : i32
    return %c0_i32, %c0_i32_0 : i32, i32
  }
  func.func @transform_17(%arg0: i32, %arg1: i32) -> (i32, i32) {
    %c0_i32 = arith.constant 0 : i32
    %c0_i32_0 = arith.constant 0 : i32
    %c0_i32_1 = arith.constant 0 : i32
    return %c0_i32, %c0_i32_0 : i32, i32
  }
  func.func @transform_18(%arg0: i32, %arg1: i32) -> (i32, i32) {
    %c0_i32 = arith.constant 0 : i32
    %c0_i32_0 = arith.constant 0 : i32
    %c0_i32_1 = arith.constant 0 : i32
    return %c0_i32, %c0_i32_0 : i32, i32
  }
  func.func @transform_19(%arg0: i32, %arg1: i32) -> (i32, i32) {
    %c0_i32 = arith.constant 0 : i32
    %c0_i32_0 = arith.constant 0 : i32
    %c0_i32_1 = arith.constant 0 : i32
    return %c0_i32, %c0_i32_0 : i32, i32
  }
  func.func @transform_20(%arg0: i32, %arg1: i32) -> (i32, i32) {
    %c0_i32 = arith.constant 0 : i32
    %c0_i32_0 = arith.constant 0 : i32
    %c0_i32_1 = arith.constant 0 : i32
    return %c0_i32, %c0_i32_0 : i32, i32
  }
  func.func @transform_21(%arg0: i32, %arg1: i32) -> (i32, i32) {
    %c0_i32 = arith.constant 0 : i32
    %c0_i32_0 = arith.constant 0 : i32
    %c0_i32_1 = arith.constant 0 : i32
    return %c0_i32, %c0_i32_0 : i32, i32
  }
  func.func @transform_22(%arg0: i32, %arg1: i32) -> (i32, i32) {
    %c0_i32 = arith.constant 0 : i32
    %c0_i32_0 = arith.constant 0 : i32
    %c0_i32_1 = arith.constant 0 : i32
    return %c0_i32, %c0_i32_0 : i32, i32
  }
  func.func @transform_23(%arg0: i32, %arg1: i32) -> (i32, i32) {
    %c0_i32 = arith.constant 0 : i32
    %c0_i32_0 = arith.constant 0 : i32
    %c0_i32_1 = arith.constant 0 : i32
    return %c0_i32, %c0_i32_0 : i32, i32
  }
  func.func @transform_24(%arg0: i32, %arg1: i32) -> (i32, i32, i32) {
    %c0_i32 = arith.constant 0 : i32
    %c0_i32_0 = arith.constant 0 : i32
    return %arg0, %arg1, %c0_i32 : i32, i32, i32
  }
  func.func @transform_25(%arg0: i32, %arg1: i32) -> (i32, i32, i32, i32) {
    %c0_i32 = arith.constant 0 : i32
    %c0_i32_0 = arith.constant 0 : i32
    %c0_i32_1 = arith.constant 0 : i32
    return %arg0, %c0_i32, %arg1, %c0_i32_0 : i32, i32, i32, i32
  }
}

</mosaic_0001>

<bundles_post_ra>
// kernel: tpu_custom_call.1
= control target key start
LH: loop header
LB: loop body
LE: loop exit
PB: predicated region body
PF: predicated region fallthrough
CT: control target
= control target key end

     0   :  { %s5460_s0 = inlined_call_operand.hbm [shape: f32[4,1,1], index: 0, kind: input, shape index: {}]   ;;  %s5461_s1 = inlined_call_operand.hbm [shape: f32[2,8,32], index: 1, kind: input, shape index: {}]   ;;  %s5462_s2 = inlined_call_operand.hbm [shape: bf16[2,8,32], index: 2, kind: input, shape index: {}]   ;;  %s5463_s3 = inlined_call_operand.hbm [shape: bf16[2,8,32], index: 3, kind: input, shape index: {}]   ;;  %s5464_s4 = inlined_call_operand.hbm [shape: f32[8,8], index: 4, kind: input, shape index: {}]   ;;  %s5465_s5 = inlined_call_operand.hbm [shape: f32[8,8], index: 5, kind: input, shape index: {}]   ;;  %s5466_s6 = inlined_call_operand.hbm [shape: bf16[8,8], index: 6, kind: input, shape index: {}]   ;;  %s5467_s7 = inlined_call_operand.hbm [shape: f32[8,8], index: 7, kind: input, shape index: {}]   ;;  %s5468_s8 = inlined_call_operand.hbm [shape: bf16[32,32], index: 8, kind: input, shape index: {}]   ;;  %s5469_s9 = inlined_call_operand.hbm [shape: f32[1,32], index: 9, kind: input, shape index: {}]   ;;  %s5470_s10 = inlined_call_operand.hbm [shape: bf16[32,32], index: 10, kind: input, shape index: {}]   ;;  %s5471_s11 = inlined_call_operand.hbm [shape: f32[1,32], index: 11, kind: input, shape index: {}]   ;;  %s5472_s12 = inlined_call_operand.hbm [shape: bf16[32,32], index: 12, kind: input, shape index: {}]   ;;  %s5473_s13 = inlined_call_operand.hbm [shape: f32[1,32], index: 13, kind: input, shape index: {}]   ;;  %s5474_s14 = inlined_call_operand.hbm [shape: bf16[32,32], index: 14, kind: input, shape index: {}]   ;;  %s5475_s15 = inlined_call_operand.hbm [shape: f32[1,32], index: 15, kind: input, shape index: {}]   ;;  %s5476_s16 = inlined_call_operand.hbm [shape: f32[1,32], index: 16, kind: input, shape index: {}]   ;;  %s5477_s17 = inlined_call_operand.hbm [shape: f32[1,32], index: 17, kind: input, shape index: {}]   ;;  %s5478_s18 = inlined_call_operand.hbm [shape: bf16[32,64], index: 18, kind: input, shape index: {}]   ;;  %s5479_s19 = inlined_call_operand.hbm [shape: f32[1,64], index: 19, kind: input, shape index: {}]   ;;  %s5480_s20 = inlined_call_operand.hbm [shape: bf16[64,32], index: 20, kind: input, shape index: {}]   ;;  %s5481_s21 = inlined_call_operand.hbm [shape: f32[1,32], index: 21, kind: input, shape index: {}]   ;;  %s5482_s22 = inlined_call_operand.hbm [shape: f32[1,32], index: 22, kind: input, shape index: {}]   ;;  %s5483_s23 = inlined_call_operand.hbm [shape: f32[1,32], index: 23, kind: input, shape index: {}]   ;;  %s5484_s24 = inlined_call_operand.hbm [shape: f32[2,8,32], index: 24, kind: output, shape index: {0}]   ;;  %s5485_s25 = inlined_call_operand.hbm [shape: bf16[2,4,8,8], index: 25, kind: output, shape index: {1}]  }
   0x1   :  { %5532 = sst [smem:[#allocation69_spill]] %s5460_s0 }
   0x2   :  { %5533 = sst [smem:[#allocation70_spill]] %s5461_s1 }
   0x3   :  { %5534 = sst [smem:[#allocation71_spill]] %s5462_s2 }
   0x4   :  { %5535 = sst [smem:[#allocation72_spill]] %s5463_s3 }
   0x5   :  { %5536 = sst [smem:[#allocation73_spill]] %s5464_s4 }
   0x6   :  { %5537 = sst [smem:[#allocation74_spill]] %s5465_s5 }
   0x7   :  { %5538 = sst [smem:[#allocation75_spill]] %s5466_s6 }
   0x8   :  { %5539 = sst [smem:[#allocation76_spill]] %s5467_s7 }
   0x9   :  { %5540 = sst [smem:[#allocation77_spill]] %s5468_s8 }
   0xa   :  { %5541 = sst [smem:[#allocation78_spill]] %s5469_s9 }
   0xb   :  { %5542 = sst [smem:[#allocation79_spill]] %s5470_s10 }
   0xc   :  { %5543 = sst [smem:[#allocation80_spill]] %s5471_s11 }
   0xd   :  { %5544 = sst [smem:[#allocation81_spill]] %s5472_s12 }
   0xe   :  { %5545 = sst [smem:[#allocation82_spill]] %s5473_s13 }
   0xf   :  { %5546 = sst [smem:[#allocation83_spill]] %s5474_s14 }
  0x10   :  { %5547 = sst [smem:[#allocation84_spill]] %s5475_s15 }
  0x11   :  { %5548 = sst [smem:[#allocation85_spill]] %s5476_s16 }
  0x12   :  { %5549 = sst [smem:[#allocation86_spill]] %s5477_s17 }
  0x13   :  { %5550 = sst [smem:[#allocation87_spill]] %s5478_s18 }
  0x14   :  { %5551 = sst [smem:[#allocation88_spill]] %s5479_s19 }
  0x15   :  { %5552 = sst [smem:[#allocation89_spill]] %s5480_s20 }
  0x16   :  { %5553 = sst [smem:[#allocation90_spill]] %s5481_s21 }
  0x17   :  { %5554 = sst [smem:[#allocation91_spill]] %s5482_s22 }
  0x18   :  { %5555 = sst [smem:[#allocation92_spill]] %s5483_s23 }
  0x19   :  { %5556 = sst [smem:[#allocation93_spill]] %s5484_s24 }
  0x1a   :  { %5557 = sst [smem:[#allocation94_spill]] %s5485_s25 }
  0x1b   :  { %31 = vsyncpa [#allocation7], 0 }
  0x1c   :  { %32 = vsyncpa [#allocation10], 0 }
  0x1d   :  { %34 = vsyncpa [#allocation10 + $0x1], 0 }
  0x1e   :  { %35 = vsyncpa [#allocation13], 0 }
  0x1f   :  { %37 = vsyncpa [#allocation13 + $0x1], 0 }
  0x20   :  { %38 = vsyncpa [#allocation16], 0 }
  0x21   :  { %39 = vsyncpa [#allocation19], 0 }
  0x22   :  { %40 = vsyncpa [#allocation22], 0 }
  0x23   :  { %41 = vsyncpa [#allocation25], 0 }
  0x24   :  { %42 = vsyncpa [#allocation28], 0 }
  0x25   :  { %43 = vsyncpa [#allocation31], 0 }
  0x26   :  { %44 = vsyncpa [#allocation34], 0 }
  0x27   :  { %45 = vsyncpa [#allocation37], 0 }
  0x28   :  { %46 = vsyncpa [#allocation40], 0 }
  0x29   :  { %47 = vsyncpa [#allocation43], 0 }
  0x2a   :  { %48 = vsyncpa [#allocation8], 0 }
  0x2b   :  { %50 = vsyncpa [#allocation8 + $0x1], 0 }
  0x2c   :  { %51 = vsyncpa [#allocation46], 0 }
  0x2d   :  { %53 = vsyncpa [#allocation46 + $0x1], 0  ;;  %s4479_s29 = smov 0   ;;  %s4481_s2 = smov 0  }
  0x2e   :  { %s4483_s6 = smov 0   ;;  %s4485_s30 = smov 0  }
  0x2f   :  { %s4487_s7 = smov 0   ;;  %s4489_s3 = smov 0  }
  0x30 LB: > { %5558 = sst [smem:[#allocation63_spill]] %s4294_s6  ;;  %s4308_s26 = smov [#allocation14]   ;;  %s4306_s3 = sphi %s4489_s3, %s59_s3   ;;  %s4302_s7 = sphi %s4487_s7, %s5648_s7   ;;  %s4298_s30 = sphi %s4485_s30, %s5647_s30   ;;  %s4294_s6 = sphi %s4483_s6, %s5643_s6   ;;  %s4290_s2 = sphi %s4481_s2, %s5646_s2   ;;  %s4286_s29 = sphi %s4479_s29, %s5645_s29  }
  0x31   : > { %5559 = sst [smem:[#allocation64_spill]] %s4298_s30  ;;  %s696_s1 = sshll.u32 %s4308_s26, 4  ;;  %s4515_s1 = int_to_ptr.vmem [resolvable:$true] %s696_s1 }
  0x32   : > { %s4510_s8 = sadd.s32 4294967295, %s4306_s3   ;;  %p2823_p0 = scmp.ge.s32.totalorder %s4306_s3, 1 }
  0x33   : > { %p5508_p1 = scmp.eq.s32.totalorder %s4510_s8, 0  ;;  %p668_p2 = scmp.lt.s32.totalorder %s4306_s3, 3 }
  0x34   : > { %s4309_s4 = smov [#allocation15]   ;;  %s4310_s9 = smov [#allocation18]  }
  0x35   : > { %p4517_p3 = pnand %p2823_p0, %p668_p2  ;;  %s709_s28 = sshll.u32 %s4309_s4, 4  ;;  %s4524_s28 = int_to_ptr.vmem [resolvable:$true] %s709_s28 }
  0x36   : > { %s733_s5 = sshll.u32 %s4310_s9, 4  ;;  %s4311_s26 = smov [#allocation21]   ;;  %s4532_s5 = int_to_ptr.vmem [resolvable:$true] %s733_s5 }
  0x37   : > { %s5560_s27 = scalar_select %p4517_p3, 1, 0 }
  0x38   : > { %p3183_p5 = pneg %p4517_p3  ;;  %s4534_s24 = sshll.u32 %s4311_s26, 4  ;;  %s758_s24 = int_to_ptr.vmem [resolvable:$true] %s4534_s24 }
  0x39   : > { %5561 = sst [smem:[#allocation65_spill]] %s5560_s27  ;;  %s5563_s27 = sld [smem:[#allocation73_spill]] }
  0x3a   : > { %p4528_p6 = pnand %p3183_p5, %p5508_p1 }
  0x3c   : > { %s5562_s0 = scalar_select %p4528_p6, 1, 0 }
  0x3d   : > { %p4544_p8 = pneg %p4528_p6 }
  0x3f   : > { %s3462_s23 = scalar_lea.hbm %s5563_s27, 128 }
  0x40   : > { %p3463_p7 = scmp.ne.s32.totalorder %s5563_s27, %s3462_s23  ;;  %p3469_p11 = scmp.lt.u32.totalorder %s3462_s23, %s5563_s27 }
  0x41   : > { %s5564_s9 = scalar_select %p4544_p8, 1, 0 }
  0x42   : > { %p3465_p9 = pnand %p4544_p8, %p3463_p7 }
  0x44   : > { %p3466_p10 = pneg %p3465_p9 }
  0x46   : > { %p3471_p12 = pnand %p3469_p11, %p3466_p10 }
  0x48   : > { %3474 = shalt.err (!%p3471_p12)
}
  0x49   : > { %s3475_s22 = scalar_lea.vmem %s4515_s1, 128  ;;  %p3483_p5 = scmp.lt.s32.totalorder %s4515_s1, %s4515_s1 }
  0x4a   : > { %p3476_p13 = scmp.ne.s32.totalorder %s4515_s1, %s3475_s22  ;;  %p3484_p4 = scmp.lt.s32.totalorder %s3475_s22, %s3475_s22 }
  0x4c   : > { %p3478_p0 = pnand %p3476_p13, %p4544_p8  ;;  %p3485_p7 = por %p3484_p4, %p3483_p5 }
  0x4e   : > { %p3479_p2 = pneg %p3478_p0 }
  0x50   : > { %p3486_p9 = pnand %p3485_p7, %p3479_p2 }
  0x52   : > { %3489 = shalt.err (!%p3486_p9)
}
  0x53   : > { %3189 = dma.hbm_to_vmem [thread:$0]  (!%p4528_p6), %s5563_s27, 128, %s4515_s1, [#allocation13]  }
  0x54   : > { %s5565_s4 = sld [smem:[#allocation74_spill]] }
  0x5a   : > { %s3490_s26 = scalar_lea.hbm %s5565_s4, 128 }
  0x5b   : > { %p3491_p10 = scmp.ne.s32.totalorder %s5565_s4, %s3490_s26  ;;  %p3497_p12 = scmp.lt.u32.totalorder %s3490_s26, %s5565_s4 }
  0x5d   : > { %p3493_p4 = pnand %p3491_p10, %p4544_p8 }
  0x5f   : > { %p3494_p11 = pneg %p3493_p4 }
  0x61   : > { %p3499_p13 = pnand %p3497_p12, %p3494_p11 }
  0x63   : > { %3502 = shalt.err (!%p3499_p13)
}
  0x64   : > { %s3503_s1 = scalar_lea.vmem %s4524_s28, 128  ;;  %p3511_p7 = scmp.lt.s32.totalorder %s4524_s28, %s4524_s28 }
  0x65   : > { %p3504_p0 = scmp.ne.s32.totalorder %s4524_s28, %s3503_s1  ;;  %p3512_p9 = scmp.lt.s32.totalorder %s3503_s1, %s3503_s1 }
  0x67   : > { %p3506_p2 = pnand %p3504_p0, %p4544_p8  ;;  %p3513_p10 = por %p3512_p9, %p3511_p7 }
  0x69   : > { %p3507_p5 = pneg %p3506_p2 }
  0x6b   : > { %p3514_p4 = pnand %p3513_p10, %p3507_p5 }
  0x6d   : > { %3517 = shalt.err (!%p3514_p4)
}
  0x6e   : > { %3192 = dma.hbm_to_vmem [thread:$0]  (!%p4528_p6), %s5565_s4, 128, %s4524_s28, [#allocation16]  }
  0x6f   : > { %s5566_s23 = sld [smem:[#allocation76_spill]] }
  0x75   : > { %s3518_s25 = scalar_lea.hbm %s5566_s23, 128 }
  0x76   : > { %p3519_p11 = scmp.ne.s32.totalorder %s5566_s23, %s3518_s25  ;;  %p3525_p0 = scmp.lt.u32.totalorder %s3518_s25, %s5566_s23 }
  0x78   : > { %p3521_p12 = pnand %p3519_p11, %p4544_p8 }
  0x7a   : > { %p3522_p13 = pneg %p3521_p12 }
  0x7c   : > { %p3527_p2 = pnand %p3525_p0, %p3522_p13 }
  0x7e   : > { %3530 = shalt.err (!%p3527_p2)
}
  0x7f   : > { %s3531_s28 = scalar_lea.vmem %s4532_s5, 128  ;;  %p3539_p10 = scmp.lt.s32.totalorder %s4532_s5, %s4532_s5 }
  0x80   : > { %p3532_p5 = scmp.ne.s32.totalorder %s4532_s5, %s3531_s28  ;;  %p3540_p4 = scmp.lt.s32.totalorder %s3531_s28, %s3531_s28 }
  0x82   : > { %p3534_p7 = pnand %p3532_p5, %p4544_p8  ;;  %p3541_p11 = por %p3540_p4, %p3539_p10 }
  0x84   : > { %p3535_p9 = pneg %p3534_p7 }
  0x86   : > { %p3542_p12 = pnand %p3541_p11, %p3535_p9 }
  0x88   : > { %3545 = shalt.err (!%p3542_p12)
}
  0x89   : > { %3198 = dma.hbm_to_vmem [thread:$0]  (!%p4528_p6), %s5566_s23, 128, %s4532_s5, [#allocation19]  }
  0x8a   : > { %s4312_s18 = smov [#allocation24]   ;;  %s5567_s26 = sld [smem:[#allocation78_spill]] }
  0x8b   : > { %s781_s20 = sshll.u32 %s4312_s18, 4  ;;  %s782_s20 = int_to_ptr.vmem [resolvable:$true] %s781_s20 }
  0x90   : > { %s3546_s22 = scalar_lea.hbm %s5567_s26, 16 }
  0x91   : > { %p3547_p13 = scmp.ne.s32.totalorder %s5567_s26, %s3546_s22  ;;  %p3553_p5 = scmp.lt.u32.totalorder %s3546_s22, %s5567_s26 }
  0x93   : > { %p3549_p0 = pnand %p3547_p13, %p4544_p8 }
  0x95   : > { %p3550_p2 = pneg %p3549_p0 }
  0x97   : > { %p3555_p7 = pnand %p3553_p5, %p3550_p2 }
  0x99   : > { %3558 = shalt.err (!%p3555_p7)
}
  0x9a   : > { %s3559_s5 = scalar_lea.vmem %s758_s24, 16  ;;  %s3566_s14 = scalar_lea.vmem %s758_s24, 32 }
  0x9b   : > { %p3560_p9 = scmp.ne.s32.totalorder %s758_s24, %s3559_s5  ;;  %p3567_p11 = scmp.lt.s32.totalorder %s758_s24, %s758_s24 }
  0x9c   : > { %p3568_p12 = scmp.lt.s32.totalorder %s3566_s14, %s3559_s5 }
  0x9d   : > { %p3562_p10 = pnand %p3560_p9, %p4544_p8 }
  0x9e   : > { %p3569_p1 = por %p3568_p12, %p3567_p11 }
  0x9f   : > { %p3563_p4 = pneg %p3562_p10 }
  0xa1   : > { %p3570_p3 = pnand %p3569_p1, %p3563_p4 }
  0xa3   : > { %3573 = shalt.err (!%p3570_p3)
}
  0xa4   : > { %3204 = dma.hbm_to_vmem [thread:$0]  (!%p4528_p6), %s5567_s26, 16, %s758_s24, [#allocation22]  }
  0xa5   : > { %s5568_s11 = sld [smem:[#allocation80_spill]] }
  0xab   : > { %s3574_s25 = scalar_lea.hbm %s5568_s11, 16 }
  0xac   : > { %p3575_p13 = scmp.ne.s32.totalorder %s5568_s11, %s3574_s25  ;;  %p3581_p3 = scmp.lt.u32.totalorder %s3574_s25, %s5568_s11 }
  0xae   : > { %p3577_p0 = pnand %p3575_p13, %p4544_p8 }
  0xb0   : > { %p3578_p1 = pneg %p3577_p0 }
  0xb2   : > { %p3583_p2 = pnand %p3581_p3, %p3578_p1 }
  0xb4   : > { %3586 = shalt.err (!%p3583_p2)
}
  0xb5   : > { %s3587_s5 = scalar_lea.vmem %s782_s20, 16  ;;  %s3594_s24 = scalar_lea.vmem %s782_s20, 32 }
  0xb6   : > { %p3588_p5 = scmp.ne.s32.totalorder %s782_s20, %s3587_s5  ;;  %p3595_p10 = scmp.lt.s32.totalorder %s782_s20, %s782_s20 }
  0xb7   : > { %p3596_p4 = scmp.lt.s32.totalorder %s3594_s24, %s3587_s5 }
  0xb8   : > { %p3590_p7 = pnand %p3588_p5, %p4544_p8 }
  0xb9   : > { %p3597_p11 = por %p3596_p4, %p3595_p10 }
  0xba   : > { %p3591_p9 = pneg %p3590_p7 }
  0xbc   : > { %p3598_p12 = pnand %p3597_p11, %p3591_p9 }
  0xbe   : > { %3601 = shalt.err (!%p3598_p12)
}
  0xbf   : > { %3210 = dma.hbm_to_vmem [thread:$0]  (!%p4528_p6), %s5568_s11, 16, %s782_s20, [#allocation25]  }
  0xc0   : > { %s4313_s18 = smov [#allocation27]   ;;  %s4314_s4 = smov [#allocation30]  }
  0xc1   : > { %s805_s27 = sshll.u32 %s4313_s18, 4  ;;  %s829_s25 = sshll.u32 %s4314_s4, 4  ;;  %s806_s27 = int_to_ptr.vmem [resolvable:$true] %s805_s27  ;;  %s830_s25 = int_to_ptr.vmem [resolvable:$true] %s829_s25 }
  0xc2   : > { %s5569_s13 = sld [smem:[#allocation82_spill]] }
  0xc8   : > { %s3602_s1 = scalar_lea.hbm %s5569_s13, 16 }
  0xc9   : > { %p3603_p13 = scmp.ne.s32.totalorder %s5569_s13, %s3602_s1  ;;  %p3609_p3 = scmp.lt.u32.totalorder %s3602_s1, %s5569_s13 }
  0xcb   : > { %p3605_p0 = pnand %p3603_p13, %p4544_p8 }
  0xcd   : > { %p3606_p1 = pneg %p3605_p0 }
  0xcf   : > { %p3611_p2 = pnand %p3609_p3, %p3606_p1 }
  0xd1   : > { %3614 = shalt.err (!%p3611_p2)
}
  0xd2   : > { %s3615_s20 = scalar_lea.vmem %s806_s27, 16  ;;  %s3622_s16 = scalar_lea.vmem %s806_s27, 32 }
  0xd3   : > { %p3616_p5 = scmp.ne.s32.totalorder %s806_s27, %s3615_s20  ;;  %p3623_p10 = scmp.lt.s32.totalorder %s806_s27, %s806_s27 }
  0xd4   : > { %p3624_p4 = scmp.lt.s32.totalorder %s3622_s16, %s3615_s20 }
  0xd5   : > { %p3618_p7 = pnand %p3616_p5, %p4544_p8 }
  0xd6   : > { %p3625_p11 = por %p3624_p4, %p3623_p10 }
  0xd7   : > { %p3619_p9 = pneg %p3618_p7 }
  0xd9   : > { %p3626_p12 = pnand %p3625_p11, %p3619_p9 }
  0xdb   : > { %3629 = shalt.err (!%p3626_p12)
}
  0xdc   : > { %3216 = dma.hbm_to_vmem [thread:$0]  (!%p4528_p6), %s5569_s13, 16, %s806_s27, [#allocation28]  }
  0xdd   : > { %s5570_s15 = sld [smem:[#allocation84_spill]] }
  0xe3   : > { %s3630_s1 = scalar_lea.hbm %s5570_s15, 16 }
  0xe4   : > { %p3631_p13 = scmp.ne.s32.totalorder %s5570_s15, %s3630_s1  ;;  %p3637_p3 = scmp.lt.u32.totalorder %s3630_s1, %s5570_s15 }
  0xe6   : > { %p3633_p0 = pnand %p3631_p13, %p4544_p8 }
  0xe8   : > { %p3634_p1 = pneg %p3633_p0 }
  0xea   : > { %p3639_p2 = pnand %p3637_p3, %p3634_p1 }
  0xec   : > { %3642 = shalt.err (!%p3639_p2)
}
  0xed   : > { %s3643_s20 = scalar_lea.vmem %s830_s25, 16  ;;  %s3650_s27 = scalar_lea.vmem %s830_s25, 32 }
  0xee   : > { %p3644_p5 = scmp.ne.s32.totalorder %s830_s25, %s3643_s20  ;;  %p3651_p10 = scmp.lt.s32.totalorder %s830_s25, %s830_s25 }
  0xef   : > { %p3652_p4 = scmp.lt.s32.totalorder %s3650_s27, %s3643_s20 }
  0xf0   : > { %p3646_p7 = pnand %p3644_p5, %p4544_p8 }
  0xf1   : > { %p3653_p11 = por %p3652_p4, %p3651_p10 }
  0xf2   : > { %p3647_p9 = pneg %p3646_p7 }
  0xf4   : > { %p3654_p12 = pnand %p3653_p11, %p3647_p9 }
  0xf6   : > { %3657 = shalt.err (!%p3654_p12)
}
  0xf7   : > { %3222 = dma.hbm_to_vmem [thread:$0]  (!%p4528_p6), %s5570_s15, 16, %s830_s25, [#allocation31]  }
  0xf8   : > { %s4315_s4 = smov [#allocation33]   ;;  %s4316_s22 = smov [#allocation36]  }
  0xf9   : > { %s851_s30 = sshll.u32 %s4315_s4, 4  ;;  %s875_s1 = sshll.u32 %s4316_s22, 4  ;;  %s852_s30 = int_to_ptr.vmem [resolvable:$true] %s851_s30  ;;  %s876_s1 = int_to_ptr.vmem [resolvable:$true] %s875_s1 }
  0xfa   : > { %s5571_s17 = sld [smem:[#allocation86_spill]] }
 0x100   : > { %s3658_s24 = scalar_lea.hbm %s5571_s17, 16 }
 0x101   : > { %p3659_p13 = scmp.ne.s32.totalorder %s5571_s17, %s3658_s24  ;;  %p3665_p3 = scmp.lt.u32.totalorder %s3658_s24, %s5571_s17 }
 0x103   : > { %p3661_p0 = pnand %p3659_p13, %p4544_p8 }
 0x105   : > { %p3662_p1 = pneg %p3661_p0 }
 0x107   : > { %p3667_p2 = pnand %p3665_p3, %p3662_p1 }
 0x109   : > { %3670 = shalt.err (!%p3667_p2)
}
 0x10a   : > { %s3671_s25 = scalar_lea.vmem %s852_s30, 16  ;;  %s3678_s18 = scalar_lea.vmem %s852_s30, 32 }
 0x10b   : > { %p3672_p5 = scmp.ne.s32.totalorder %s852_s30, %s3671_s25  ;;  %p3679_p10 = scmp.lt.s32.totalorder %s852_s30, %s852_s30 }
 0x10c   : > { %p3680_p4 = scmp.lt.s32.totalorder %s3678_s18, %s3671_s25 }
 0x10d   : > { %p3674_p7 = pnand %p3672_p5, %p4544_p8 }
 0x10e   : > { %p3681_p11 = por %p3680_p4, %p3679_p10 }
 0x10f   : > { %p3675_p9 = pneg %p3674_p7 }
 0x111   : > { %p3682_p12 = pnand %p3681_p11, %p3675_p9 }
 0x113   : > { %3685 = shalt.err (!%p3682_p12)
}
 0x114   : > { %3228 = dma.hbm_to_vmem [thread:$0]  (!%p4528_p6), %s5571_s17, 16, %s852_s30, [#allocation34]  }
 0x115   : > { %s5572_s19 = sld [smem:[#allocation88_spill]] }
 0x11b   : > { %s3686_s24 = scalar_lea.hbm %s5572_s19, 16 }
 0x11c   : > { %p3687_p13 = scmp.ne.s32.totalorder %s5572_s19, %s3686_s24  ;;  %p3693_p3 = scmp.lt.u32.totalorder %s3686_s24, %s5572_s19 }
 0x11e   : > { %p3689_p0 = pnand %p3687_p13, %p4544_p8 }
 0x120   : > { %p3690_p1 = pneg %p3689_p0 }
 0x122   : > { %p3695_p2 = pnand %p3693_p3, %p3690_p1 }
 0x124   : > { %3698 = shalt.err (!%p3695_p2)
}
 0x125   : > { %s3699_s25 = scalar_lea.vmem %s876_s1, 16  ;;  %s3706_s30 = scalar_lea.vmem %s876_s1, 32 }
 0x126   : > { %p3700_p5 = scmp.ne.s32.totalorder %s876_s1, %s3699_s25  ;;  %p3707_p10 = scmp.lt.s32.totalorder %s876_s1, %s876_s1 }
 0x127   : > { %p3708_p4 = scmp.lt.s32.totalorder %s3706_s30, %s3699_s25 }
 0x128   : > { %p3702_p7 = pnand %p3700_p5, %p4544_p8 }
 0x129   : > { %p3709_p11 = por %p3708_p4, %p3707_p10 }
 0x12a   : > { %p3703_p9 = pneg %p3702_p7 }
 0x12c   : > { %p3710_p12 = pnand %p3709_p11, %p3703_p9 }
 0x12e   : > { %3713 = shalt.err (!%p3710_p12)
}
 0x12f   : > { %3234 = dma.hbm_to_vmem [thread:$0]  (!%p4528_p6), %s5572_s19, 16, %s876_s1, [#allocation37]  }
 0x130   : > { %s4317_s22 = smov [#allocation39]   ;;  %s5573_s21 = sld [smem:[#allocation90_spill]] }
 0x131   : > { %s899_s28 = sshll.u32 %s4317_s22, 4  ;;  %s900_s28 = int_to_ptr.vmem [resolvable:$true] %s899_s28 }
 0x136   : > { %s3714_s14 = scalar_lea.hbm %s5573_s21, 16 }
 0x137   : > { %p3715_p13 = scmp.ne.s32.totalorder %s5573_s21, %s3714_s14  ;;  %p3721_p3 = scmp.lt.u32.totalorder %s3714_s14, %s5573_s21 }
 0x139   : > { %p3717_p0 = pnand %p3715_p13, %p4544_p8 }
 0x13b   : > { %p3718_p1 = pneg %p3717_p0 }
 0x13d   : > { %p3723_p2 = pnand %p3721_p3, %p3718_p1 }
 0x13f   : > { %3726 = shalt.err (!%p3723_p2)
}
 0x140   : > { %s3727_s1 = scalar_lea.vmem %s900_s28, 16  ;;  %s3734_s30 = scalar_lea.vmem %s900_s28, 32 }
 0x141   : > { %p3728_p5 = scmp.ne.s32.totalorder %s900_s28, %s3727_s1  ;;  %p3735_p10 = scmp.lt.s32.totalorder %s900_s28, %s900_s28 }
 0x142   : > { %p3736_p4 = scmp.lt.s32.totalorder %s3734_s30, %s3727_s1 }
 0x143   : > { %p3730_p7 = pnand %p3728_p5, %p4544_p8 }
 0x144   : > { %p3737_p11 = por %p3736_p4, %p3735_p10 }
 0x145   : > { %p3731_p9 = pneg %p3730_p7 }
 0x147   : > { %p3738_p12 = pnand %p3737_p11, %p3731_p9 }
 0x149   : > { %3741 = shalt.err (!%p3738_p12)
}
 0x14a   : > { %3240 = dma.hbm_to_vmem [thread:$0]  (!%p4528_p6), %s5573_s21, 16, %s900_s28, [#allocation40]  }
 0x14b   : > { %s2822_s22 = sadd.s32 4294967294, %s4306_s3   ;;  %s71_s5 = sadd.s32 1, %s4302_s7 }
 0x14c   : > { %p73_p13 = scmp.ge.s32.totalorder %s71_s5, 2  ;;  %s101_s24 = sadd.s32 1, %s4294_s6 }
 0x14d   : > { %p108_p0 = scmp.ne.s32.totalorder %s4294_s6, %s4290_s2  ;;  %p109_p1 = scmp.eq.s32.totalorder %s4306_s3, 0 }
 0x14e   : > { %s5650_s5 = smov (%p73_p13, %s71_s5), 0  ;;  %p114_p2 = scmp.ne.s32.totalorder %s4290_s2, %s4286_s29 }
 0x14f   : > { %5574 = sst [smem:[#allocation66_spill]] %s5650_s5  ;;  %p4746_p3 = por %p109_p1, %p108_p0 }
 0x150   : > { %s96_s28 = ssub.s32 %s4302_s7, %s5650_s5  ;;  %p627_p5 = scmp.eq.s32.totalorder %s4510_s8, 1 }
 0x151   : > { %p99_p7 = scmp.eq.s32.totalorder %s96_s28, 0  ;;  %p5576_p9 = scmp.eq.s32.totalorder %s4510_s8, 0 }
 0x152   : > { %p4761_p4 = por %p627_p5, %p108_p0  ;;  %p633_p11 = scmp.eq.s32.totalorder %s2822_s22, 1 }
 0x153   : > { %p4757_p10 = por %p5576_p9, %p114_p2  ;;  %p3285_p13 = scmp.lt.s32.totalorder %s4306_s3, 2 }
 0x154   : > { %s5578_s27 = scalar_select %p4761_p4, 1, 0 }
 0x155   : > { %s5577_s20 = scalar_select %p4757_p10, 1, 0 }
 0x156   : > { %s4766_s16 = scalar_select %p99_p7, %s4294_s6, %s101_s24  }
 0x157   : > { %p4768_p12 = por %p633_p11, %p114_p2  ;;  %s934_s30 = sand.u32 1, %s4294_s6  }
 0x158   : > { %5579 = sst [smem:[#allocation67_spill]] %s4766_s16  ;;  %s2846_s18 = sshll.u32 %s934_s30, 3 }
 0x159   : > { %s5580_s25 = scalar_select %p4768_p12, 1, 0 }
 0x15a   : > { %s2847_s4 = sshll.u32 %s4302_s7, 7  ;;  %s5582_s13 = sld [smem:[#allocation70_spill]] }
 0x15b   : > { %5581 = sst [smem:[#allocation68_spill]] %s5580_s25  ;;  %s936_s22 = scalar_lea.vmem [#allocation9], %s2846_s18 }
 0x15c   : > { %s944_s24 = sshll.u32 %s936_s22, 4  ;;  %p4785_p0 = pnand %p3285_p13, %p4746_p3  ;;  %s4781_s24 = int_to_ptr.vmem [resolvable:$true] %s944_s24 }
 0x15d   : > { %s4789_s1 = sshll.u32 %s934_s30, 2  ;;  %s5584_s19 = sand.u32 1, %s4306_s3  }
 0x15e   : > { %s5583_s17 = scalar_select %p4785_p0, 1, 0 }
 0x15f   : > { %s4793_s11 = scalar_lea.sflag [#allocation10], %s5584_s19  ;;  %p4799_p2 = pneg %p4785_p0 }
 0x160   : > { %s4779_s15 = scalar_lea.hbm %s5582_s13, %s2847_s4  ;;  %s3747_s22 = scalar_lea.hbm %s5582_s13, 256 }
 0x161   : > { %s3742_s4 = scalar_lea.hbm %s4779_s15, 128  ;;  %p3748_p7 = scmp.lt.u32.totalorder %s4779_s15, %s5582_s13 }
 0x162   : > { %p3743_p1 = scmp.ne.s32.totalorder %s4779_s15, %s3742_s4  ;;  %p3749_p9 = scmp.lt.u32.totalorder %s3747_s22, %s3742_s4 }
 0x163   : > { %s5585_s28 = scalar_select %p4799_p2, 1, 0 }
 0x164   : > { %p3745_p5 = pnand %p4799_p2, %p3743_p1  ;;  %p3750_p11 = por %p3749_p9, %p3748_p7 }
 0x165   : > { %p3751_p13 = scmp.lt.u32.totalorder %s3742_s4, %s4779_s15 }
 0x166   : > { %p3746_p3 = pneg %p3745_p5 }
 0x167   : > { %p3752_p12 = por %p3751_p13, %p3750_p11 }
 0x169   : > { %p3753_p4 = pnand %p3752_p12, %p3746_p3 }
 0x16b   : > { %3756 = shalt.err (!%p3753_p4)
}
 0x16c   : > { %s3757_s19 = scalar_lea.vmem %s4781_s24, 128  ;;  %s4318_s14 = smov [#allocation9]  }
 0x16d   : > { %p3758_p1 = scmp.ne.s32.totalorder %s4781_s24, %s3757_s19  ;;  %s3762_s18 = sshll.u32 %s4318_s14, 4  ;;  %s3763_s18 = int_to_ptr.vmem [resolvable:$false] %s3762_s18 }
 0x16e   : > { %s3764_s21 = scalar_lea.vmem %s3763_s18, 256  ;;  %p3765_p6 = scmp.lt.s32.totalorder %s4781_s24, %s3763_s18 }
 0x16f   : > { %p3760_p5 = pnand %p3758_p1, %p4799_p2  ;;  %p3766_p8 = scmp.lt.s32.totalorder %s3764_s21, %s3757_s19 }
 0x171   : > { %p3761_p10 = pneg %p3760_p5  ;;  %p3767_p7 = por %p3766_p8, %p3765_p6 }
 0x173   : > { %p3768_p9 = pnand %p3767_p7, %p3761_p10 }
 0x175   : > { %3771 = shalt.err (!%p3768_p9)
}
 0x176   : > { %3250 = dma.hbm_to_vmem [thread:$0]  (!%p4785_p0), %s4779_s15, 128, %s4781_s24, %s4793_s11  }
 0x177   : > { %s4319_s4 = smov [#allocation6]   ;;  %s5586_s14 = sld [smem:[#allocation69_spill]] }
 0x178   : > { %s680_s22 = sshll.u32 %s4319_s4, 4  ;;  %p5587_p8 = scmp.ne.s32.totalorder %s5564_s9, 0  ;;  %s681_s22 = int_to_ptr.vmem [resolvable:$true] %s680_s22 }
 0x17d   : > { %s3772_s23 = scalar_lea.hbm %s5586_s14, 64 }
 0x17e   : > { %p3773_p6 = scmp.ne.s32.totalorder %s5586_s14, %s3772_s23  ;;  %p3779_p12 = scmp.lt.u32.totalorder %s3772_s23, %s5586_s14 }
 0x180   : > { %p3775_p10 = pnand %p3773_p6, %p5587_p8 }
 0x182   : > { %p3776_p4 = pneg %p3775_p10 }
 0x184   : > { %p3781_p3 = pnand %p3779_p12, %p3776_p4 }
 0x186   : > { %3784 = shalt.err (!%p3781_p3)
}
 0x187   : > { %s3785_s15 = scalar_lea.vmem %s681_s22, 64  ;;  %p3793_p5 = scmp.lt.s32.totalorder %s681_s22, %s681_s22 }
 0x188   : > { %p3786_p11 = scmp.ne.s32.totalorder %s681_s22, %s3785_s15  ;;  %p3794_p7 = scmp.lt.s32.totalorder %s3785_s15, %s3785_s15 }
 0x18a   : > { %p3788_p13 = pnand %p3786_p11, %p5587_p8  ;;  %p3795_p9 = por %p3794_p7, %p3793_p5 }
 0x18c   : > { %p3789_p1 = pneg %p3788_p13 }
 0x18e   : > { %p3796_p0 = pnand %p3795_p9, %p3789_p1 }
 0x190   : > { %3799 = shalt.err (!%p3796_p0)
}
 0x191   : > { %s4320_s13 = smov 16   ;;  %s4321_s26 = smov 1  }
 0x192   : > { %p5588_p6 = scmp.ne.s32.totalorder %s5562_s0, 0  ;;  %s4322_s4 = smov [#allocation17]  }
 0x193   : > { %s720_s30 = sshll.u32 %s4322_s4, 4  ;;  %s4323_s18 = smov [#allocation20]   ;;  %s721_s30 = int_to_ptr.vmem [resolvable:$true] %s720_s30 }
 0x194   : > { %3186 = dma.hbm_to_vmem [thread:$0]  (!%p5588_p6), %s5586_s14, 64, %s681_s22, [#allocation7], %s4320_s13, %s4320_s13, %s4321_s26  }
 0x195   : > { %s743_s19 = sshll.u32 %s4323_s18, 4  ;;  %s5589_s5 = sld [smem:[#allocation75_spill]]  ;;  %s4841_s19 = int_to_ptr.vmem [resolvable:$true] %s743_s19 }
 0x19b   : > { %s3800_s16 = scalar_lea.hbm %s5589_s5, 64 }
 0x19c   : > { %p3801_p0 = scmp.ne.s32.totalorder %s5589_s5, %s3800_s16  ;;  %p3807_p12 = scmp.lt.u32.totalorder %s3800_s16, %s5589_s5 }
 0x19e   : > { %p3803_p10 = pnand %p3801_p0, %p5587_p8 }
 0x1a0   : > { %p3804_p4 = pneg %p3803_p10 }
 0x1a2   : > { %p3809_p3 = pnand %p3807_p12, %p3804_p4 }
 0x1a4   : > { %3812 = shalt.err (!%p3809_p3)
}
 0x1a5   : > { %s3813_s13 = scalar_lea.vmem %s721_s30, 64  ;;  %p3821_p5 = scmp.lt.s32.totalorder %s721_s30, %s721_s30 }
 0x1a6   : > { %p3814_p11 = scmp.ne.s32.totalorder %s721_s30, %s3813_s13  ;;  %p3822_p7 = scmp.lt.s32.totalorder %s3813_s13, %s3813_s13 }
 0x1a8   : > { %p3816_p13 = pnand %p3814_p11, %p5587_p8  ;;  %p3823_p9 = por %p3822_p7, %p3821_p5 }
 0x1aa   : > { %p3817_p1 = pneg %p3816_p13 }
 0x1ac   : > { %p3824_p2 = pnand %p3823_p9, %p3817_p1 }
 0x1ae   : > { %3827 = shalt.err (!%p3824_p2)
}
 0x1af   : > { %3195 = dma.hbm_to_vmem [thread:$0]  (!%p5588_p6), %s5589_s5, 64, %s721_s30, [#allocation16]  }
 0x1b0   : > { %s5590_s23 = sld [smem:[#allocation77_spill]] }
 0x1b6   : > { %s3828_s4 = scalar_lea.hbm %s5590_s23, 256 }
 0x1b7   : > { %p3829_p0 = scmp.ne.s32.totalorder %s5590_s23, %s3828_s4  ;;  %p3835_p2 = scmp.lt.u32.totalorder %s3828_s4, %s5590_s23 }
 0x1b9   : > { %p3831_p10 = pnand %p3829_p0, %p5587_p8 }
 0x1bb   : > { %p3832_p4 = pneg %p3831_p10 }
 0x1bd   : > { %p3837_p12 = pnand %p3835_p2, %p3832_p4 }
 0x1bf   : > { %3840 = shalt.err (!%p3837_p12)
}
 0x1c0   : > { %s3841_s30 = scalar_lea.vmem %s4841_s19, 256  ;;  %p3849_p1 = scmp.lt.s32.totalorder %s4841_s19, %s4841_s19 }
 0x1c1   : > { %p3842_p3 = scmp.ne.s32.totalorder %s4841_s19, %s3841_s30  ;;  %p3850_p5 = scmp.lt.s32.totalorder %s3841_s30, %s3841_s30 }
 0x1c3   : > { %p3844_p11 = pnand %p3842_p3, %p5587_p8  ;;  %p3851_p7 = por %p3850_p5, %p3849_p1 }
 0x1c5   : > { %p3845_p13 = pneg %p3844_p11 }
 0x1c7   : > { %p3852_p9 = pnand %p3851_p7, %p3845_p13 }
 0x1c9   : > { %3855 = shalt.err (!%p3852_p9)
}
 0x1ca   : > { %s5528_s22 = smov 64   ;;  %s4325_s13 = smov 4  }
 0x1cb   : > { %3201 = dma.hbm_to_vmem [thread:$0]  (!%p5588_p6), %s5590_s23, 256, %s4841_s19, [#allocation19], %s5528_s22, %s5528_s22, %s4325_s13  }
 0x1cc   : > { %s4326_s16 = smov [#allocation23]   ;;  %s4327_s4 = smov [#allocation26]  }
 0x1cd   : > { %s767_s26 = sshll.u32 %s4326_s16, 4  ;;  %s791_s18 = sshll.u32 %s4327_s4, 4  ;;  %s768_s26 = int_to_ptr.vmem [resolvable:$true] %s767_s26  ;;  %s4887_s18 = int_to_ptr.vmem [resolvable:$true] %s791_s18 }
 0x1ce   : > { %s5591_s10 = sld [smem:[#allocation79_spill]] }
 0x1d4   : > { %s3856_s24 = scalar_lea.hbm %s5591_s10, 256 }
 0x1d5   : > { %p3857_p0 = scmp.ne.s32.totalorder %s5591_s10, %s3856_s24  ;;  %p3863_p2 = scmp.lt.u32.totalorder %s3856_s24, %s5591_s10 }
 0x1d7   : > { %p3859_p10 = pnand %p3857_p0, %p5587_p8 }
 0x1d9   : > { %p3860_p4 = pneg %p3859_p10 }
 0x1db   : > { %p3865_p12 = pnand %p3863_p2, %p3860_p4 }
 0x1dd   : > { %3868 = shalt.err (!%p3865_p12)
}
 0x1de   : > { %s3869_s25 = scalar_lea.vmem %s768_s26, 256  ;;  %p3877_p1 = scmp.lt.s32.totalorder %s768_s26, %s768_s26 }
 0x1df   : > { %p3870_p3 = scmp.ne.s32.totalorder %s768_s26, %s3869_s25  ;;  %p3878_p5 = scmp.lt.s32.totalorder %s3869_s25, %s3869_s25 }
 0x1e1   : > { %p3872_p11 = pnand %p3870_p3, %p5587_p8  ;;  %p3879_p7 = por %p3878_p5, %p3877_p1 }
 0x1e3   : > { %p3873_p13 = pneg %p3872_p11 }
 0x1e5   : > { %p3880_p9 = pnand %p3879_p7, %p3873_p13 }
 0x1e7   : > { %3883 = shalt.err (!%p3880_p9)
}
 0x1e8   : > { %3207 = dma.hbm_to_vmem [thread:$0]  (!%p5588_p6), %s5591_s10, 256, %s768_s26, [#allocation22], %s5528_s22, %s5528_s22, %s4325_s13  }
 0x1e9   : > { %s5592_s12 = sld [smem:[#allocation81_spill]] }
 0x1ef   : > { %s3884_s15 = scalar_lea.hbm %s5592_s12, 256 }
 0x1f0   : > { %p3885_p0 = scmp.ne.s32.totalorder %s5592_s12, %s3884_s15  ;;  %p3891_p2 = scmp.lt.u32.totalorder %s3884_s15, %s5592_s12 }
 0x1f2   : > { %p3887_p10 = pnand %p3885_p0, %p5587_p8 }
 0x1f4   : > { %p3888_p4 = pneg %p3887_p10 }
 0x1f6   : > { %p3893_p12 = pnand %p3891_p2, %p3888_p4 }
 0x1f8   : > { %3896 = shalt.err (!%p3893_p12)
}
 0x1f9   : > { %s3897_s26 = scalar_lea.vmem %s4887_s18, 256  ;;  %p3905_p1 = scmp.lt.s32.totalorder %s4887_s18, %s4887_s18 }
 0x1fa   : > { %p3898_p3 = scmp.ne.s32.totalorder %s4887_s18, %s3897_s26  ;;  %p3906_p5 = scmp.lt.s32.totalorder %s3897_s26, %s3897_s26 }
 0x1fc   : > { %p3900_p11 = pnand %p3898_p3, %p5587_p8  ;;  %p3907_p7 = por %p3906_p5, %p3905_p1 }
 0x1fe   : > { %p3901_p13 = pneg %p3900_p11 }
 0x200   : > { %p3908_p9 = pnand %p3907_p7, %p3901_p13 }
 0x202   : > { %3911 = shalt.err (!%p3908_p9)
}
 0x203   : > { %3213 = dma.hbm_to_vmem [thread:$0]  (!%p5588_p6), %s5592_s12, 256, %s4887_s18, [#allocation25], %s5528_s22, %s5528_s22, %s4325_s13  }
 0x204   : > { %s4328_s16 = smov [#allocation29]   ;;  %s4329_s21 = smov [#allocation32]  }
 0x205   : > { %s815_s4 = sshll.u32 %s4328_s16, 4  ;;  %s840_s15 = sshll.u32 %s4329_s21, 4  ;;  %s816_s4 = int_to_ptr.vmem [resolvable:$true] %s815_s4  ;;  %s4936_s15 = int_to_ptr.vmem [resolvable:$true] %s840_s15 }
 0x206   : > { %s5593_s6 = sld [smem:[#allocation83_spill]] }
 0x20c   : > { %s5594_s19 = smov %s5593_s6  ;;  %s3912_s26 = scalar_lea.hbm %s5593_s6, 256 }
 0x20d   : > { %p3913_p0 = scmp.ne.s32.totalorder %s5594_s19, %s3912_s26  ;;  %p3919_p2 = scmp.lt.u32.totalorder %s3912_s26, %s5594_s19 }
 0x20f   : > { %p3915_p10 = pnand %p3913_p0, %p5587_p8 }
 0x211   : > { %p3916_p4 = pneg %p3915_p10 }
 0x213   : > { %p3921_p12 = pnand %p3919_p2, %p3916_p4 }
 0x215   : > { %3924 = shalt.err (!%p3921_p12)
}
 0x216   : > { %s3925_s5 = scalar_lea.vmem %s816_s4, 256  ;;  %p3933_p1 = scmp.lt.s32.totalorder %s816_s4, %s816_s4 }
 0x217   : > { %p3926_p3 = scmp.ne.s32.totalorder %s816_s4, %s3925_s5  ;;  %p3934_p5 = scmp.lt.s32.totalorder %s3925_s5, %s3925_s5 }
 0x219   : > { %p3928_p11 = pnand %p3926_p3, %p5587_p8  ;;  %p3935_p7 = por %p3934_p5, %p3933_p1 }
 0x21b   : > { %p3929_p13 = pneg %p3928_p11 }
 0x21d   : > { %p3936_p9 = pnand %p3935_p7, %p3929_p13 }
 0x21f   : > { %3939 = shalt.err (!%p3936_p9)
}
 0x220   : > { %3219 = dma.hbm_to_vmem [thread:$0]  (!%p5588_p6), %s5594_s19, 256, %s816_s4, [#allocation28], %s5528_s22, %s5528_s22, %s4325_s13  }
 0x221   : > { %s5595_s24 = sld [smem:[#allocation85_spill]] }
 0x227   : > { %s3940_s30 = scalar_lea.hbm %s5595_s24, 16 }
 0x228   : > { %p3941_p0 = scmp.ne.s32.totalorder %s5595_s24, %s3940_s30  ;;  %p3947_p2 = scmp.lt.u32.totalorder %s3940_s30, %s5595_s24 }
 0x22a   : > { %p3943_p10 = pnand %p3941_p0, %p5587_p8 }
 0x22c   : > { %p3944_p4 = pneg %p3943_p10 }
 0x22e   : > { %p3949_p12 = pnand %p3947_p2, %p3944_p4 }
 0x230   : > { %3952 = shalt.err (!%p3949_p12)
}
 0x231   : > { %s3953_s4 = scalar_lea.vmem %s4936_s15, 16  ;;  %s3960_s5 = scalar_lea.vmem %s4936_s15, 32 }
 0x232   : > { %p3954_p3 = scmp.ne.s32.totalorder %s4936_s15, %s3953_s4  ;;  %p3961_p1 = scmp.lt.s32.totalorder %s4936_s15, %s4936_s15 }
 0x233   : > { %p3962_p5 = scmp.lt.s32.totalorder %s3960_s5, %s3953_s4 }
 0x234   : > { %p3956_p11 = pnand %p3954_p3, %p5587_p8 }
 0x235   : > { %p3963_p7 = por %p3962_p5, %p3961_p1 }
 0x236   : > { %p3957_p13 = pneg %p3956_p11 }
 0x238   : > { %p3964_p9 = pnand %p3963_p7, %p3957_p13 }
 0x23a   : > { %3967 = shalt.err (!%p3964_p9)
}
 0x23b   : > { %3225 = dma.hbm_to_vmem [thread:$0]  (!%p5588_p6), %s5595_s24, 16, %s4936_s15, [#allocation31]  }
 0x23c   : > { %s4330_s16 = smov [#allocation35]   ;;  %s4331_s30 = smov [#allocation38]  }
 0x23d   : > { %s861_s21 = sshll.u32 %s4330_s16, 4  ;;  %s885_s6 = sshll.u32 %s4331_s30, 4  ;;  %s862_s21 = int_to_ptr.vmem [resolvable:$true] %s861_s21  ;;  %s4983_s6 = int_to_ptr.vmem [resolvable:$true] %s885_s6 }
 0x23e   : > { %s5596_s18 = sld [smem:[#allocation87_spill]] }
 0x244   : > { %s3968_s4 = scalar_lea.hbm %s5596_s18, 256 }
 0x245   : > { %p3969_p0 = scmp.ne.s32.totalorder %s5596_s18, %s3968_s4  ;;  %p3975_p2 = scmp.lt.u32.totalorder %s3968_s4, %s5596_s18 }
 0x247   : > { %p3971_p10 = pnand %p3969_p0, %p5587_p8 }
 0x249   : > { %p3972_p4 = pneg %p3971_p10 }
 0x24b   : > { %p3977_p12 = pnand %p3975_p2, %p3972_p4 }
 0x24d   : > { %3980 = shalt.err (!%p3977_p12)
}
 0x24e   : > { %s3981_s14 = scalar_lea.vmem %s862_s21, 256  ;;  %p3989_p1 = scmp.lt.s32.totalorder %s862_s21, %s862_s21 }
 0x24f   : > { %p3982_p3 = scmp.ne.s32.totalorder %s862_s21, %s3981_s14  ;;  %p3990_p5 = scmp.lt.s32.totalorder %s3981_s14, %s3981_s14 }
 0x251   : > { %p3984_p11 = pnand %p3982_p3, %p5587_p8  ;;  %p3991_p7 = por %p3990_p5, %p3989_p1 }
 0x253   : > { %p3985_p13 = pneg %p3984_p11 }
 0x255   : > { %p3992_p9 = pnand %p3991_p7, %p3985_p13 }
 0x257   : > { %3995 = shalt.err (!%p3992_p9)
}
 0x258   : > { %s5597_s22 = smov 64   ;;  %s5598_s4 = sld [smem:[#allocation89_spill]] }
 0x259   : > { %3231 = dma.hbm_to_vmem [thread:$0]  (!%p5588_p6), %s5596_s18, 256, %s862_s21, [#allocation34], %s5597_s22, %s5597_s22, %s4325_s13  }
 0x25e   : > { %s3996_s5 = scalar_lea.hbm %s5598_s4, 512 }
 0x25f   : > { %p3997_p0 = scmp.ne.s32.totalorder %s5598_s4, %s3996_s5  ;;  %p4003_p2 = scmp.lt.u32.totalorder %s3996_s5, %s5598_s4 }
 0x261   : > { %p3999_p10 = pnand %p3997_p0, %p5587_p8 }
 0x263   : > { %p4000_p4 = pneg %p3999_p10 }
 0x265   : > { %p4005_p12 = pnand %p4003_p2, %p4000_p4 }
 0x267   : > { %4008 = shalt.err (!%p4005_p12)
}
 0x268   : > { %s4009_s21 = scalar_lea.vmem %s4983_s6, 512  ;;  %p4017_p1 = scmp.lt.s32.totalorder %s4983_s6, %s4983_s6 }
 0x269   : > { %p4010_p3 = scmp.ne.s32.totalorder %s4983_s6, %s4009_s21  ;;  %p4018_p5 = scmp.lt.s32.totalorder %s4009_s21, %s4009_s21 }
 0x26b   : > { %p4012_p11 = pnand %p4010_p3, %p5587_p8  ;;  %p4019_p7 = por %p4018_p5, %p4017_p1 }
 0x26d   : > { %p4013_p13 = pneg %p4012_p11 }
 0x26f   : > { %p4020_p9 = pnand %p4019_p7, %p4013_p13 }
 0x271   : > { %4023 = shalt.err (!%p4020_p9)
}
 0x272   : > { %3237 = dma.hbm_to_vmem [thread:$0]  (!%p5588_p6), %s5598_s4, 512, %s4983_s6, [#allocation37], %s5597_s22, %s5597_s22, %s4325_s13  }
 0x273   : > { %s4332_s30 = smov [#allocation41]   ;;  %s4333_s25 = smov [#allocation42]  }
 0x274   : > { %s910_s26 = sshll.u32 %s4332_s30, 4  ;;  %s921_s5 = sshll.u32 %s4333_s25, 4  ;;  %s911_s26 = int_to_ptr.vmem [resolvable:$true] %s910_s26  ;;  %s5032_s5 = int_to_ptr.vmem [resolvable:$true] %s921_s5 }
 0x275   : > { %s5599_s14 = sld [smem:[#allocation91_spill]] }
 0x27b   : > { %s4024_s21 = scalar_lea.hbm %s5599_s14, 16 }
 0x27c   : > { %p4025_p0 = scmp.ne.s32.totalorder %s5599_s14, %s4024_s21  ;;  %p4031_p2 = scmp.lt.u32.totalorder %s4024_s21, %s5599_s14 }
 0x27e   : > { %p4027_p10 = pnand %p4025_p0, %p5587_p8 }
 0x280   : > { %p4028_p4 = pneg %p4027_p10 }
 0x282   : > { %p4033_p12 = pnand %p4031_p2, %p4028_p4 }
 0x284   : > { %4036 = shalt.err (!%p4033_p12)
}
 0x285   : > { %s4037_s6 = scalar_lea.vmem %s911_s26, 16  ;;  %s4044_s22 = scalar_lea.vmem %s911_s26, 32 }
 0x286   : > { %p4038_p3 = scmp.ne.s32.totalorder %s911_s26, %s4037_s6  ;;  %p4045_p1 = scmp.lt.s32.totalorder %s911_s26, %s911_s26 }
 0x287   : > { %p4046_p5 = scmp.lt.s32.totalorder %s4044_s22, %s4037_s6 }
 0x288   : > { %p4040_p11 = pnand %p4038_p3, %p5587_p8 }
 0x289   : > { %p4047_p7 = por %p4046_p5, %p4045_p1 }
 0x28a   : > { %p4041_p13 = pneg %p4040_p11 }
 0x28c   : > { %p4048_p9 = pnand %p4047_p7, %p4041_p13 }
 0x28e   : > { %4051 = shalt.err (!%p4048_p9)
}
 0x28f   : > { %3243 = dma.hbm_to_vmem [thread:$0]  (!%p5588_p6), %s5599_s14, 16, %s911_s26, [#allocation40]  }
 0x290   : > { %s5600_s25 = sld [smem:[#allocation92_spill]] }
 0x296   : > { %s4052_s10 = scalar_lea.hbm %s5600_s25, 16 }
 0x297   : > { %p4053_p0 = scmp.ne.s32.totalorder %s5600_s25, %s4052_s10  ;;  %p4059_p2 = scmp.lt.u32.totalorder %s4052_s10, %s5600_s25 }
 0x299   : > { %p4055_p10 = pnand %p4053_p0, %p5587_p8 }
 0x29b   : > { %p4056_p4 = pneg %p4055_p10 }
 0x29d   : > { %p4061_p12 = pnand %p4059_p2, %p4056_p4 }
 0x29f   : > { %4064 = shalt.err (!%p4061_p12)
}
 0x2a0   : > { %s4065_s26 = scalar_lea.vmem %s5032_s5, 16  ;;  %s4072_s6 = scalar_lea.vmem %s5032_s5, 32 }
 0x2a1   : > { %p4066_p3 = scmp.ne.s32.totalorder %s5032_s5, %s4065_s26  ;;  %p4073_p1 = scmp.lt.s32.totalorder %s5032_s5, %s5032_s5 }
 0x2a2   : > { %p4074_p5 = scmp.lt.s32.totalorder %s4072_s6, %s4065_s26 }
 0x2a3   : > { %p4068_p11 = pnand %p4066_p3, %p5587_p8 }
 0x2a4   : > { %p4075_p7 = por %p4074_p5, %p4073_p1 }
 0x2a5   : > { %p4069_p13 = pneg %p4068_p11 }
 0x2a7   : > { %p4076_p9 = pnand %p4075_p7, %p4069_p13 }
 0x2a9   : > { %4079 = shalt.err (!%p4076_p9)
}
 0x2aa   : > { %3246 = dma.hbm_to_vmem [thread:$0]  (!%p5588_p6), %s5600_s25, 16, %s5032_s5, [#allocation43]  }
 0x2ab   : > { %s2849_s9 = sshll.u32 %s4302_s7, 6  ;;  %s5601_s30 = sld [smem:[#allocation71_spill]] }
 0x2ac   : > { %s955_s0 = scalar_lea.vmem [#allocation11], %s4789_s1  ;;  %p5603_p0 = scmp.ne.s32.totalorder %s5585_s28, 0 }
 0x2ad   : > { %s962_s21 = sshll.u32 %s955_s0, 4  ;;  %s963_s21 = int_to_ptr.vmem [resolvable:$true] %s962_s21 }
 0x2b1   : > { %s5602_s10 = smov %s5601_s30  ;;  %s5082_s15 = scalar_lea.hbm %s5601_s30, %s2849_s9 }
 0x2b2   : > { %s4080_s12 = scalar_lea.hbm %s5082_s15, 64  ;;  %s4085_s26 = scalar_lea.hbm %s5602_s10, 128 }
 0x2b3   : > { %p4081_p8 = scmp.ne.s32.totalorder %s5082_s15, %s4080_s12  ;;  %p4086_p6 = scmp.lt.u32.totalorder %s5082_s15, %s5602_s10 }
 0x2b4   : > { %p4087_p2 = scmp.lt.u32.totalorder %s4085_s26, %s4080_s12  ;;  %p4089_p3 = scmp.lt.u32.totalorder %s4080_s12, %s5082_s15 }
 0x2b5   : > { %p4083_p10 = pnand %p4081_p8, %p5603_p0 }
 0x2b6   : > { %p4088_p12 = por %p4087_p2, %p4086_p6 }
 0x2b7   : > { %p4084_p4 = pneg %p4083_p10 }
 0x2b8   : > { %p4090_p11 = por %p4089_p3, %p4088_p12 }
 0x2ba   : > { %p4091_p13 = pnand %p4090_p11, %p4084_p4 }
 0x2bc   : > { %4094 = shalt.err (!%p4091_p13)
}
 0x2bd   : > { %s4095_s19 = scalar_lea.vmem %s963_s21, 64  ;;  %s4334_s18 = smov [#allocation11]  }
 0x2be   : > { %p4096_p1 = scmp.ne.s32.totalorder %s963_s21, %s4095_s19  ;;  %s4100_s16 = sshll.u32 %s4334_s18, 4  ;;  %s4101_s16 = int_to_ptr.vmem [resolvable:$false] %s4100_s16 }
 0x2bf   : > { %s4102_s30 = scalar_lea.vmem %s4101_s16, 128  ;;  %p4103_p9 = scmp.lt.s32.totalorder %s963_s21, %s4101_s16 }
 0x2c0   : > { %p4098_p5 = pnand %p4096_p1, %p5603_p0  ;;  %p4104_p8 = scmp.lt.s32.totalorder %s4102_s30, %s4095_s19 }
 0x2c2   : > { %p4099_p7 = pneg %p4098_p5  ;;  %p4105_p10 = por %p4104_p8, %p4103_p9 }
 0x2c4   : > { %p4106_p2 = pnand %p4105_p10, %p4099_p7 }
 0x2c6   : > { %4109 = shalt.err (!%p4106_p2)
}
 0x2c7   : > { %p5604_p6 = scmp.ne.s32.totalorder %s5583_s17, 0  ;;  %s5605_s5 = sld [smem:[#allocation72_spill]] }
 0x2c8   : > { %s973_s26 = scalar_lea.vmem [#allocation12], %s4789_s1  ;;  %s5606_s22 = sand.u32 1, %s4306_s3  }
 0x2c9   : > { %3253 = dma.hbm_to_vmem [thread:$0]  (!%p5604_p6), %s5082_s15, 64, %s963_s21, %s4793_s11  }
 0x2ca   : > { %s980_s6 = sshll.u32 %s973_s26, 4  ;;  %s970_s19 = scalar_lea.sflag [#allocation13], %s5606_s22  ;;  %s981_s6 = int_to_ptr.vmem [resolvable:$true] %s980_s6 }
 0x2cd   : > { %s5108_s13 = scalar_lea.hbm %s5605_s5, %s2849_s9  ;;  %s4115_s21 = scalar_lea.hbm %s5605_s5, 128 }
 0x2ce   : > { %s4110_s18 = scalar_lea.hbm %s5108_s13, 64  ;;  %p4116_p11 = scmp.lt.u32.totalorder %s5108_s13, %s5605_s5 }
 0x2cf   : > { %p4111_p4 = scmp.ne.s32.totalorder %s5108_s13, %s4110_s18  ;;  %p4117_p13 = scmp.lt.u32.totalorder %s4115_s21, %s4110_s18 }
 0x2d0   : > { %p4119_p5 = scmp.lt.u32.totalorder %s4110_s18, %s5108_s13 }
 0x2d1   : > { %p4113_p12 = pnand %p4111_p4, %p5603_p0  ;;  %p4118_p1 = por %p4117_p13, %p4116_p11 }
 0x2d3   : > { %p4114_p3 = pneg %p4113_p12  ;;  %p4120_p7 = por %p4119_p5, %p4118_p1 }
 0x2d5   : > { %p4121_p9 = pnand %p4120_p7, %p4114_p3 }
 0x2d7   : > { %4124 = shalt.err (!%p4121_p9)
}
 0x2d8   : > { %s4125_s1 = scalar_lea.vmem %s981_s6, 64  ;;  %s4335_s30 = smov [#allocation12]  }
 0x2d9   : > { %p4126_p8 = scmp.ne.s32.totalorder %s981_s6, %s4125_s1  ;;  %s4130_s0 = sshll.u32 %s4335_s30, 4  ;;  %s4131_s0 = int_to_ptr.vmem [resolvable:$false] %s4130_s0 }
 0x2da   : > { %s4132_s12 = scalar_lea.vmem %s4131_s0, 128  ;;  %p4133_p4 = scmp.lt.s32.totalorder %s981_s6, %s4131_s0 }
 0x2db   : > { %p4128_p10 = pnand %p4126_p8, %p5603_p0  ;;  %p4134_p12 = scmp.lt.s32.totalorder %s4132_s12, %s4125_s1 }
 0x2dd   : > { %p4129_p2 = pneg %p4128_p10  ;;  %p4135_p6 = por %p4134_p12, %p4133_p4 }
 0x2df   : > { %p4136_p11 = pnand %p4135_p6, %p4129_p2 }
 0x2e1   : > { %4139 = shalt.err (!%p4136_p11)
}
 0x2e2   : > { %p5607_p13 = scmp.ne.s32.totalorder %s5583_s17, 0  ;;  %s5608_s26 = sld [smem:[#allocation65_spill]] }
 0x2e4   : > { %3256 = dma.hbm_to_vmem [thread:$0]  (!%p5607_p13), %s5108_s13, 64, %s981_s6, %s970_s19  }
 0x2e8   : > { %p5609_p3 = scmp.ne.s32.totalorder %s5608_s26, 0 }
 0x2e9   : > { %p5610_p1 = scmp.eq.s32.totalorder (!%p5609_p3), %s4510_s8, 0 }
 0x2ea   : > { %989 = sbr.rel (%p5609_p3) target bundleno = 3926 (0xf56), region = 116 }
 0x2f1   : > { %4221 = dma.done.wait (%p5610_p1), [#allocation7], 64   ;;  %p5611_p0 = pmov %p5610_p1 }
 0x2f2   : > { %s995_s28 = sand.u32 1, %s4510_s8   ;;  %s5138_s22 = sand.u32 1, %s4290_s2  }
 0x2f3   : > { %4223 = vsyncadd (%p5611_p0), [#allocation7], 4294967232  ;;  %s2854_s17 = sshll.u32 %s5138_s22, 3  ;;  %s996_s18 = scalar_lea.sflag [#allocation10], %s995_s28 }
 0x2f4   : > { %s5143_s13 = scalar_lea.vmem [#allocation9], %s2854_s17  ;;  %p5612_p6 = scmp.ne.s32.totalorder %s5577_s20, 0 }
 0x2f6   : > { %4225 = dma.done.wait (%p5612_p6), %s996_s18, 192  }
 0x2f7   : > { %4227 = vsyncadd (%p5612_p6), %s996_s18, 4294967104  ;;  %s2855_s6 = sshll.u32 %s5138_s22, 2  ;;  %s1014_s11 = scalar_lea.sflag [#allocation13], %s995_s28 }
 0x2f8   : > { %s5150_s19 = scalar_lea.vmem [#allocation11], %s2855_s6  ;;  %s5152_s15 = scalar_lea.vmem [#allocation12], %s2855_s6 }
 0x2f9   : > { %4229 = dma.done.wait (%p5612_p6), %s1014_s11, 64  }
 0x2fa   : > { %4231 = vsyncadd (%p5612_p6), %s1014_s11, 4294967232  ;;  %p5613_p5 = pmov %p5611_p0 }
 0x2fb   : > { %p5614_p7 = pmov %p5611_p0 }
 0x2fc   : > { %4233 = dma.done.wait (%p5613_p5), [#allocation13], 128  }
 0x2fd   : > { %4235 = vsyncadd (%p5614_p7), [#allocation13], 4294967168  ;;  %p5615_p9 = pmov %p5611_p0 }
 0x2fe   : > { %p5616_p8 = pmov %p5611_p0 }
 0x2ff   : > { %4237 = dma.done.wait (%p5615_p9), [#allocation16], 192  }
 0x300   : > { %4239 = vsyncadd (%p5616_p8), [#allocation16], 4294967104  ;;  %p5617_p10 = pmov %p5611_p0 }
 0x301   : > { %p5618_p2 = pmov %p5611_p0 }
 0x302   : > { %4241 = dma.done.wait (%p5617_p10), [#allocation19], 384  }
 0x303   : > { %4243 = vsyncadd (%p5618_p2), [#allocation19], 4294966912  ;;  %p5619_p4 = pmov %p5611_p0 }
 0x304   : > { %p5620_p12 = pmov %p5611_p0 }
 0x305   : > { %4245 = dma.done.wait (%p5619_p4), [#allocation22], 272  }
 0x306   : > { %4247 = vsyncadd (%p5620_p12), [#allocation22], 4294967024  ;;  %p5621_p11 = pmov %p5611_p0 }
 0x307   : > { %p5622_p13 = pmov %p5611_p0 }
 0x308   : > { %4249 = dma.done.wait (%p5621_p11), [#allocation25], 272  }
 0x309   : > { %4251 = vsyncadd (%p5622_p13), [#allocation25], 4294967024  ;;  %p5623_p3 = pmov %p5611_p0 }
 0x30a   : > { %p5624_p1 = pmov %p5611_p0 }
 0x30b   : > { %4253 = dma.done.wait (%p5623_p3), [#allocation28], 272  }
 0x30c   : > { %4255 = vsyncadd (%p5624_p1), [#allocation28], 4294967024 }
 0x30d   : > { %4257 = dma.done.wait (%p5611_p0), [#allocation31], 32   ;;  %p5625_p6 = pmov %p5611_p0 }
 0x30e   : > { %p5626_p5 = pmov %p5611_p0 }
 0x30f   : > { %4259 = vsyncadd (%p5625_p6), [#allocation31], 4294967264 }
 0x310   : > { %4261 = dma.done.wait (%p5626_p5), [#allocation34], 272   ;;  %p5627_p7 = pmov %p5611_p0 }
 0x311   : > { %p5628_p9 = pmov %p5611_p0 }
 0x312   : > { %4263 = vsyncadd (%p5627_p7), [#allocation34], 4294967024 }
 0x313   : > { %4265 = dma.done.wait (%p5628_p9), [#allocation37], 528   ;;  %p5629_p8 = pmov %p5611_p0 }
 0x314   : > { %p5630_p10 = pmov %p5611_p0 }
 0x315   : > { %4267 = vsyncadd (%p5629_p8), [#allocation37], 4294966768 }
 0x316   : > { %4269 = dma.done.wait (%p5630_p10), [#allocation40], 32   ;;  %p5631_p2 = pmov %p5611_p0 }
 0x317   : > { %p5632_p4 = pmov %p5611_p0 }
 0x318   : > { %4271 = vsyncadd (%p5631_p2), [#allocation40], 4294967264 }
 0x319   : > { %4273 = dma.done.wait (%p5632_p4), [#allocation43], 16   ;;  %p5633_p12 = pmov %p5611_p0 }
 0x31a   : > { %v4336_v0 = vmov 0.0   ;;  %vm4337_vm0 = vmmov 0   ;;  %v3394_v1 = vld [vmem:[#allocation23] sm:$0xff]   ;;  %v3395_v2 = vld [vmem:[#allocation20] sm:$0xff]   ;;  %vm1208_vm1 = vcmask 261120   ;;  %v3397_v5 = vld [vmem:[#allocation20 + $0x8] sm:$0xff]  }
 0x31b   : > { %4275 = vsyncadd (%p5633_p12), [#allocation43], 4294967280  ;;  %2982 = vmatprep.subr.bf16.mxu1 %v4336_v0  ;;  %2998 = vmatprep.subr.bf16.mxu0 %v4336_v0  ;;  %v3396_v3 = vld [vmem:[#allocation23 + $0x8] sm:$0xff]   ;;  %v5212_v6 = vld [vmem:[%s5143_s13] sm:$0xff]  ;;  %vm1321_vm2 = vcmask 60416   ;;  %s4338_s8 = smov 104  }
 0x31c   : > { %2986 = vmatprep.mubr.msk.bf16.mxu1 %vm4337_vm0, %v4336_v0  ;;  %3002 = vmatprep.mubr.msk.bf16.mxu0 %vm4337_vm0, %v4336_v0  ;;  %v1184_v4 = vld [vmem:[%s5150_s19] sm:$0xf]  ;;  %v1361_v7 = vpack.c.bf16 %v5212_v6, %v5212_v6  ;;  %v3398_v8 = vld [vmem:[#allocation26] sm:$0xff]   ;;  %v3399_v9 = vld [vmem:[#allocation26 + $0x8] sm:$0xff]   ;;  %s4339_s20 = smov 120   ;;  %s4340_s21 = smov 112  }
 0x31d   : > { %2983 = vmatpush3.bf16.msra.mxu1 %v3394_v1  ;;  %2999 = vmatpush3.bf16.msra.mxu0 %v3395_v2  ;;  %v1252_v10 = vld [vmem:[%s5152_s15] sm:$0xf]  ;;  %v2889_v12 = vld [vmem:[#allocation21] ss:$0 sm:$0xff]  ;;  %vm1463_vm3 = vcmask 64512   ;;  %vm1712_vm4 = vcmask 1043456  }
 0x31e   : > { %2984 = vmatprep.subr.bf16.mxu1 %v4336_v0  ;;  %3000 = vmatprep.subr.bf16.mxu0 %v4336_v0  ;;  %v2879_v11 = vld [vmem:[#allocation24] ss:$0 sm:$0xff]  ;;  %v2883_v29 = vld [vmem:[#allocation27] ss:$0 sm:$0xff]  ;;  %v5267_v53 = vld [vmem:[#allocation14] sm:$0xff]  ;;  %s2878_s9 = sshll.u32 %s5138_s22, 4 }
 0x31f   : > { %s5329_s16 = scalar_lea.vmem [#allocation45], %s2878_s9  ;;  %s4342_s1 = smov 8   ;;  %vm2114_vm13 = vcmask 126016   ;;  %vm2123_vm14 = vcmask 191616   ;;  %vm2132_vm15 = vcmask 257216  }
 0x320   : > { %s4343_s30 = smov 16   ;;  %s4344_s0 = smov 24  }
 0x321   : > { %2985 = vmatpush3.bf16.msra.mxu1 %v3396_v3  ;;  %3001 = vmatpush3.bf16.msra.mxu0 %v3397_v5  ;;  %s5634_s12 = sld [smem:[#allocation64_spill]]  ;;  %s2453_s28 = sshll.u32 %s5329_s16, 4  ;;  %s5378_s28 = int_to_ptr.vmem [resolvable:$true] %s2453_s28 }
 0x322   : > { %2990 = vmatprep.subr.bf16.mxu1 %v4336_v0  ;;  %3012 = vmatprep.subr.bf16.mxu0 %v4336_v0  ;;  %s5635_s6 = sld [smem:[#allocation94_spill]]  ;;  %s2425_s15 = scalar_lea.sflag [#allocation46], %s5138_s22 }
 0x323   : > { %p5637_p13 = scmp.ne.s32.totalorder %s5578_s27, 0 }
 0x324   : > { %2987 = vmatmul.mubr.msk.bf16.vlgmr.msra.gmra.mrb[0].mxu1 %vm1208_vm1, %v1184_v4  ;;  %3003 = vmatmul.mubr.msk.bf16.vlgmr.msra.gmra.mrb[0].mxu0 %vm1208_vm1, %v1361_v7 }
 0x325   : > { %2994 = vmatprep.mubr.msk.bf16.mxu1 %vm4337_vm0, %v4336_v0  ;;  %3014 = vmatprep.mubr.msk.bf16.mxu0 %vm4337_vm0, %v4336_v0 }
 0x326   : > { %2991 = vmatpush3.bf16.msra.mxu1 %v3398_v8 }
 0x327   : > { %2992 = vmatprep.subr.bf16.mxu1 %v4336_v0  ;;  %s2942_s26 = sshll.u32 %s5634_s12, 8 }
 0x328   : > { %s5636_s19 = smov %s5635_s6  ;;  %s5376_s11 = scalar_lea.hbm %s5635_s6, %s2942_s26 }
 0x32a   : > { %2993 = vmatpush3.bf16.msra.mxu1 %v3399_v9 }
 0x32b   : > { %3006 = vmatprep.subr.bf16.mxu1 %v4336_v0 }
 0x32d   : > { %2995 = vmatmul.mubr.msk.bf16.vlgmr.msra.gmra.mrb[4].mxu1 %vm1208_vm1, %v1252_v10 }
 0x32e   : > { %3008 = vmatprep.mubr.msk.bf16.mxu1 %vm4337_vm0, %v4336_v0 }
 0x3f7   : > { %v1246_v13 = vpop.f32.mrb[0].mxu1  ;;  %v1423_v16 = vpop.f32.mrb[0].mxu0 }
 0x3f8   : > { %v1247_v14 = vadd.f32 %v2879_v11, %v1246_v13  ;;  %v2988_v15 = vpop.f32.mrb[1].mxu1  ;;  %v1424_v18 = vadd.f32 %v2889_v12, %v1423_v16  ;;  %v3004_v19 = vpop.f32.mrb[1].mxu0 }
 0x3f9   : > { %v1249_v17 = vpop.f32.mrb[2].mxu1  ;;  %v1426_v22 = vpop.f32.mrb[2].mxu0 }
 0x3fa   : > { %v1319_v20 = vpack.c.bf16 %v1247_v14, %v1247_v14  ;;  %v2989_v21 = vpop.f32.mrb[3].mxu1  ;;  %v1429_v23 = vmul.f32 0.35355338, %v1424_v18  ;;  %v3005_v24 = vpop.f32.mrb[3].mxu0 }
 0x3fc   : > { %1322 = vst.msk [vmem:[#allocation2] sm:$0xf] %vm1321_vm2, %v1319_v20  ;;  %1350 = vrot.lane.b32.xlu1 %v1319_v20, %s4338_s8  ;;  %1327 = vrot.lane.b32.xlu0 %v1319_v20, %s4339_s20  ;;  %v1430_v25 = vpack.c.bf16 %v1429_v23, %v1429_v23 }
 0x3fe   : > { %1432 = vst.msk [vmem:[#allocation4] sm:$0xf] %vm1321_vm2, %v1430_v25 }
 0x400   : > { %1340 = vrot.lane.b32.xlu0 %v1319_v20, %s4340_s21  ;;  %1436 = vrot.lane.b32.xlu1 %v1430_v25, %s4339_s20  ;;  %v1313_v30 = vpop.f32.mrb[4].mxu1 }
 0x401   : > { %v1314_v31 = vadd.f32 %v2883_v29, %v1313_v30  ;;  %v2996_v32 = vpop.f32.mrb[5].mxu1 }
 0x402   : > { %v1316_v33 = vpop.f32.mrb[6].mxu1 }
 0x403   : > { %v1455_v26 = vld [vmem:[#allocation2] sm:$0xf]  ;;  %v5243_v34 = vpack.c.bf16 %v1314_v31, %v1314_v31  ;;  %v2997_v35 = vpop.f32.mrb[7].mxu1 }
 0x404   : > { %1446 = vrot.lane.b32.xlu1 %v1430_v25, %s4338_s8  ;;  %1441 = vrot.lane.b32.xlu0 %v1430_v25, %s4340_s21  ;;  %v1468_v27 = vsel %vm1463_vm3, %v1455_v26, 0 }
 0x405   : > { %3007 = vmatpush3.bf16.xpose.msra.mxu1 %v1468_v27  ;;  %v1451_v28 = vld [vmem:[#allocation4] sm:$0xf]  ;;  %1323 = vst.msk [vmem:[#allocation3] sm:$0xf] %vm1321_vm2, %v5243_v34 }
 0x406   : > { %3018 = vmatprep.subr.bf16.mxu1 %v4336_v0 }
 0x40c   : > { %3009 = vmatmul.mubr.msk.bf16.vlgmr.msra.gmra.mrb[8].mxu1 %vm1463_vm3, %v1451_v28  ;;  %v1459_v51 = vld [vmem:[#allocation3] sm:$0xf] }
 0x40d   : > { %3020 = vmatprep.mubr.msk.bf16.mxu1 %vm4337_vm0, %v4336_v0  ;;  %v1925_v52 = vsel %vm1712_vm4, %v1459_v51, 0  ;;  %v1649_v51 = vld [vmem:[#allocation15] sm:$0xff] }
 0x46e   : > { %v1351_v36 = vpop.permute.xlu1 %1350  ;;  %v1328_v37 = vpop.permute.xlu0 %1327 }
 0x46f   : > { %1354 = vst.msk [vmem:[#allocation2 + $0xc] sm:$0xf] %vm1321_vm2, %v1351_v36  ;;  %1331 = vst.msk [vmem:[#allocation2 + $0x4] sm:$0xf] %vm1321_vm2, %v1328_v37  ;;  %v1705_v37 = vld [vmem:[#allocation17] sm:$0xf] }
 0x472   : > { %v1341_v38 = vpop.permute.xlu0 %1340  ;;  %v1437_v39 = vpop.permute.xlu1 %1436 }
 0x473   : > { %1344 = vst.msk [vmem:[#allocation2 + $0x8] sm:$0xf] %vm1321_vm2, %v1341_v38  ;;  %1440 = vst.msk [vmem:[#allocation4 + $0x4] sm:$0xf] %vm1321_vm2, %v1437_v39  ;;  %v1714_v38 = vsel %vm1712_vm4, %v1705_v37, 0 }
 0x474   : > { %v2900_v39 = vld [vmem:[#allocation6] ss:$0 sm:$0xff] }
 0x476   : > { %v1447_v40 = vpop.permute.xlu1 %1446  ;;  %v1442_v41 = vpop.permute.xlu0 %1441  ;;  %v1456_v42 = vld [vmem:[#allocation2 + $0x4] sm:$0xf]  ;;  %v1458_v47 = vld [vmem:[#allocation2 + $0xc] sm:$0xf] }
 0x477   : > { %1450 = vst.msk [vmem:[#allocation4 + $0xc] sm:$0xf] %vm1321_vm2, %v1447_v40  ;;  %1445 = vst.msk [vmem:[#allocation4 + $0x8] sm:$0xf] %vm1321_vm2, %v1442_v41  ;;  %v1514_v43 = vsel %vm1463_vm3, %v1456_v42, 0  ;;  %v1606_v48 = vsel %vm1463_vm3, %v1458_v47, 0 }
 0x478   : > { %3013 = vmatpush3.bf16.xpose.msra.mxu0 %v1514_v43  ;;  %v4341_v40 = vmov 0   ;;  %v2901_v41 = vld [vmem:[#allocation6 + $0x1] ss:$0 sm:$0xff]  ;;  %v2902_v42 = vld [vmem:[#allocation6 + $0x2] ss:$0 sm:$0xff] }
 0x479   : > { %3024 = vmatprep.subr.bf16.mxu0 %v4336_v0  ;;  %3392 = vset.pattern.permute.xlu1 %v4341_v40  ;;  %v2903_v43 = vld [vmem:[#allocation6 + $0x3] ss:$0 sm:$0xff] }
 0x47a   : > { %v1457_v44 = vld [vmem:[#allocation2 + $0x8] sm:$0xf]  ;;  %v1452_v46 = vld [vmem:[#allocation4 + $0x4] sm:$0xf]  ;;  %3393 = vset.pattern.permute.xlu0 %v4341_v40 }
 0x47b   : > { %v1560_v45 = vsel %vm1463_vm3, %v1457_v44, 0 }
 0x47c   : > { %3019 = vmatpush3.bf16.xpose.msra.mxu1 %v1560_v45 }
 0x47d   : > { %3088 = vmatprep.subr.msk.bf16.mxu1 %vm1712_vm4, %v1705_v37 }
 0x47e   : > { %v1453_v49 = vld [vmem:[#allocation4 + $0x8] sm:$0xf]  ;;  %v1454_v50 = vld [vmem:[#allocation4 + $0xc] sm:$0xf] }
 0x47f   : > { %3015 = vmatmul.mubr.msk.bf16.vlgmr.msra.gmra.mrb[4].mxu0 %vm1463_vm3, %v1452_v46 }
 0x480   : > { %3025 = vmatpush3.bf16.xpose.msra.mxu0 %v1606_v48  ;;  %3026 = vmatprep.mubr.msk.bf16.mxu0 %vm4337_vm0, %v4336_v0 }
 0x481   : > { %3036 = vmatprep.subr.bf16.mxu0 %v4336_v0 }
 0x483   : > { %3021 = vmatmul.mubr.msk.bf16.vlgmr.msra.gmra.mrb[12].mxu1 %vm1463_vm3, %v1453_v49 }
 0x484   : > { %3031 = vmatpush3.bf16.msra.mxu1 %v1714_v38 }
 0x485   : > { %3042 = vmatprep.subr.bf16.mxu1 %v4336_v0 }
 0x487   : > { %3027 = vmatmul.mubr.msk.bf16.vlgmr.msra.gmra.mrb[8].mxu0 %vm1463_vm3, %v1454_v50 }
 0x488   : > { %3038 = vmatprep.mubr.msk.bf16.mxu0 %vm4337_vm0, %v4336_v0  ;;  %3037 = vmatpush3.bf16.msra.mxu0 %v1925_v52 }
 0x489   : > { %3048 = vmatprep.subr.bf16.mxu0 %v4336_v0 }
 0x4df   : > { %v5269_v54 = vpop.f32.mrb[8].mxu1 }
 0x4e0   : > { %v1651_v55 = vadd.f32 %v5267_v53, %v5269_v54  ;;  %v3010_v56 = vpop.f32.mrb[9].mxu1 }
 0x4e1   : > { %v1507_v57 = vpop.f32.mrb[10].mxu1 }
 0x4e2   : > { %v3011_v58 = vpop.f32.mrb[11].mxu1  ;;  %v1655_v59 = vsel %vm1463_vm3, %v1651_v55, -inf }
 0x4e3   : > { %1656 = vmax.xlane.f32.xlu0 %v1655_v59 }
 0x552   : > { %v5274_v60 = vpop.f32.mrb[4].mxu0 }
 0x553   : > { %v1652_v61 = vadd.f32 %v5267_v53, %v5274_v60  ;;  %v3016_v62 = vpop.f32.mrb[5].mxu0 }
 0x554   : > { %v1553_v63 = vpop.f32.mrb[6].mxu0 }
 0x555   : > { %v3017_v1 = vpop.f32.mrb[7].mxu0  ;;  %v1658_v2 = vsel %vm1463_vm3, %v1652_v61, -inf }
 0x556   : > { %1659 = vmax.xlane.f32.xlu1 %v1658_v2  ;;  %v5279_v3 = vpop.f32.mrb[12].mxu1 }
 0x557   : > { %v1653_v4 = vadd.f32 %v5267_v53, %v5279_v3  ;;  %v3022_v5 = vpop.f32.mrb[13].mxu1 }
 0x558   : > { %v1599_v7 = vpop.f32.mrb[14].mxu1 }
 0x559   : > { %v3023_v8 = vpop.f32.mrb[15].mxu1  ;;  %v1661_v9 = vsel %vm1463_vm3, %v1653_v4, -inf }
 0x55a   : > { %v5284_v10 = vpop.f32.mrb[8].mxu0  ;;  %1662 = vmax.xlane.f32.xlu0 %v1661_v9 }
 0x55b   : > { %v1654_v11 = vadd.f32 %v5267_v53, %v5284_v10  ;;  %v3028_v12 = vpop.f32.mrb[9].mxu0 }
 0x55c   : > { %v1645_v13 = vpop.f32.mrb[10].mxu0 }
 0x55d   : > { %v3029_v14 = vpop.f32.mrb[11].mxu0  ;;  %v1664_v15 = vsel %vm1463_vm3, %v1654_v11, -inf }
 0x55e   : > { %1665 = vmax.xlane.f32.xlu0 %v1664_v15 }
 0x570   : > { %v1657_v16 = vpop.xlane.xlu0 %1656 }
 0x571   : > { %v1667_v17 = vsub.f32 %v1651_v55, %v1657_v16 }
 0x573   : > { %v1671_v18 = vmul.f32 1.442695, %v1667_v17 }
 0x575   : > { %3408 = vpow2.f32 %v1671_v18 }
 0x57f   : > { %v3409_v19 = vpop.eup %3408 }
 0x580   : > { %v1679_v20 = vsel %vm1463_vm3, %v3409_v19, 0.0 }
 0x581   : > { %1680 = vadd.xlane.f32.xlu1 %v1679_v20 }
 0x5e3   : > { %v1660_v21 = vpop.xlane.xlu1 %1659 }
 0x5e4   : > { %v1668_v22 = vsub.f32 %v1652_v61, %v1660_v21 }
 0x5e6   : > { %v1673_v23 = vmul.f32 1.442695, %v1668_v22 }
 0x5e7   : > { %v1663_v24 = vpop.xlane.xlu0 %1662 }
 0x5e8   : > { %3410 = vpow2.f32 %v1673_v23  ;;  %v1669_v25 = vsub.f32 %v1653_v4, %v1663_v24  ;;  %v1650_v4 = vld [vmem:[#allocation18] sm:$0xff] }
 0x5ea   : > { %v1675_v26 = vmul.f32 1.442695, %v1669_v25 }
 0x5eb   : > { %v1666_v27 = vpop.xlane.xlu0 %1665 }
 0x5ec   : > { %3412 = vpow2.f32 %v1675_v26  ;;  %v1670_v28 = vsub.f32 %v1654_v11, %v1666_v27 }
 0x5ee   : > { %v1677_v29 = vmul.f32 1.442695, %v1670_v28 }
 0x5f0   : > { %3414 = vpow2.f32 %v1677_v29 }
 0x5f2   : > { %v3411_v30 = vpop.eup %3410 }
 0x5f3   : > { %v1682_v31 = vsel %vm1463_vm3, %v3411_v30, 0.0 }
 0x5f4   : > { %1683 = vadd.xlane.f32.xlu0 %v1682_v31 }
 0x5f6   : > { %v3413_v32 = vpop.eup %3412 }
 0x5f7   : > { %v1685_v33 = vsel %vm1463_vm3, %v3413_v32, 0.0 }
 0x5f8   : > { %1686 = vadd.xlane.f32.xlu1 %v1685_v33 }
 0x5fa   : > { %v3415_v35 = vpop.eup %3414 }
 0x5fb   : > { %v1688_v36 = vsel %vm1463_vm3, %v3415_v35, 0.0 }
 0x5fc   : > { %1689 = vadd.xlane.f32.xlu0 %v1688_v36 }
 0x609   : > { %1826 = vperm.xlu1 %3392, %v2900_v39  }
 0x60d   : > { %1834 = vperm.xlu1 %3392, %v2902_v42  }
 0x60e   : > { %v1681_v44 = vpop.xlane.xlu1 %1680 }
 0x60f   : > { %3416 = vrcp.f32 %v1681_v44 }
 0x611   : > { %1838 = vperm.xlu1 %3392, %v2903_v43  }
 0x612   : > { %1830 = vperm.xlu0 %3393, %v2901_v41  }
 0x619   : > { %v3417_v47 = vpop.eup %3416 }
 0x61a   : > { %v1692_v49 = vmul.f32 %v3417_v47, %v3409_v19 }
 0x61c   : > { %v1699_v55 = vmul.f32 %v1692_v49, %v1649_v51 }
 0x681   : > { %v1684_v45 = vpop.xlane.xlu0 %1683 }
 0x682   : > { %3418 = vrcp.f32 %v1684_v45 }
 0x685   : > { %v1687_v46 = vpop.xlane.xlu1 %1686 }
 0x686   : > { %3420 = vrcp.f32 %v1687_v46 }
 0x689   : > { %v1690_v48 = vpop.xlane.xlu0 %1689  ;;  %v1827_v19 = vpop.permute.xlu1 %1826 }
 0x68a   : > { %3422 = vrcp.f32 %v1690_v48 }
 0x68c   : > { %v3419_v50 = vpop.eup %3418 }
 0x68d   : > { %v1694_v52 = vmul.f32 %v3419_v50, %v3411_v30  ;;  %v1835_v20 = vpop.permute.xlu1 %1834 }
 0x68f   : > { %v1700_v56 = vmul.f32 %v1694_v52, %v1649_v51 }
 0x690   : > { %v3421_v57 = vpop.eup %3420 }
 0x691   : > { %v1703_v58 = vpack.c.bf16 %v1700_v56, %v1699_v55  ;;  %v1696_v59 = vmul.f32 %v3421_v57, %v3413_v32  ;;  %v1831_v40 = vpop.permute.xlu0 %1830 }
 0x693   : > { %3032 = vmatprep.mubr.msk.bf16.mxu1 %vm1463_vm3, %v1703_v58  ;;  %v1701_v63 = vmul.f32 %v1696_v59, %v1649_v51 }
 0x694   : > { %v3423_v61 = vpop.eup %3422 }
 0x695   : > { %v1698_v62 = vmul.f32 %v3423_v61, %v3415_v35  ;;  %v1839_v35 = vpop.permute.xlu1 %1838 }
 0x697   : > { %v1702_v1 = vmul.f32 %v1698_v62, %v1649_v51 }
 0x699   : > { %v1704_v2 = vpack.c.bf16 %v1702_v1, %v1701_v63 }
 0x69b   : > { %3033 = vmatmul.mubr.msk.bf16.vlgmr.msra.gmra.mrb[16].mxu1 %vm1463_vm3, %v1704_v2 }
 0x69c   : > { %3044 = vmatprep.mubr.msk.bf16.mxu1 %vm4337_vm0, %v4336_v0 }
 0x76e   : > { %v3034_v5 = vpop.f32.mrb[16].mxu1 }
 0x76f   : > { %v1767_v7 = vmul.f32 %v3034_v5, %v1650_v4  ;;  %v1750_v8 = vpop.f32.mrb[17].mxu1 }
 0x770   : > { %v1765_v9 = vmul.f32 %v1750_v8, %v1650_v4  ;;  %v3035_v11 = vpop.f32.mrb[18].mxu1 }
 0x771   : > { %v1771_v12 = vmax.f32 %v1767_v7, 0.0  ;;  %v1768_v13 = vmul.f32 %v3035_v11, %v1650_v4  ;;  %v1753_v14 = vpop.f32.mrb[19].mxu1 }
 0x772   : > { %v1769_v15 = vmax.f32 %v1765_v9, 0.0  ;;  %v1766_v16 = vmul.f32 %v1753_v14, %v1650_v4 }
 0x773   : > { %3424 = vrsqrt.f32 %v1771_v12  ;;  %v1772_v17 = vmax.f32 %v1768_v13, 0.0  ;;  %vm1789_vm5 = vcmp.eq.f32.partialorder %v1771_v12, inf  ;;  %vm1791_vm8 = vcmp.eq.f32.partialorder %v1771_v12, 0.0 }
 0x774   : > { %3426 = vrsqrt.f32 %v1769_v15  ;;  %v1770_v18 = vmax.f32 %v1766_v16, 0.0  ;;  %vm1775_vm6 = vcmp.eq.f32.partialorder %v1769_v15, inf  ;;  %vm1777_vm7 = vcmp.eq.f32.partialorder %v1769_v15, 0.0 }
 0x775   : > { %3428 = vrsqrt.f32 %v1772_v17  ;;  %v1778_v26 = vand.u32 2147483648, %v1769_v15  ;;  %v1792_v27 = vand.u32 2147483648, %v1771_v12  ;;  %vm1796_vm9 = vcmp.eq.f32.partialorder %v1772_v17, inf }
 0x776   : > { %3430 = vrsqrt.f32 %v1770_v18  ;;  %vm1798_vm10 = vcmp.eq.f32.partialorder %v1772_v17, 0.0  ;;  %v1799_v31 = vand.u32 2147483648, %v1772_v17  ;;  %vm1782_vm11 = vcmp.eq.f32.partialorder %v1770_v18, inf }
 0x777   : > { %v1785_v41 = vand.u32 2147483648, %v1770_v18  ;;  %vm1784_vm12 = vcmp.eq.f32.partialorder %v1770_v18, 0.0 }
 0x77d   : > { %v3425_v21 = vpop.eup %3424 }
 0x77e   : > { %v3427_v22 = vpop.eup %3426  ;;  %v1788_v23 = vmul.f32 %v3425_v21, %v1771_v12 }
 0x77f   : > { %v3429_v24 = vpop.eup %3428  ;;  %v1774_v25 = vmul.f32 %v3427_v22, %v1769_v15 }
 0x780   : > { %v3431_v28 = vpop.eup %3430  ;;  %v1790_v29 = vsel %vm1789_vm5, %v1771_v12, %v1788_v23  ;;  %v1795_v30 = vmul.f32 %v3429_v24, %v1772_v17 }
 0x781   : > { %v1776_v32 = vsel %vm1775_vm6, %v1769_v15, %v1774_v25  ;;  %v1793_v33 = vsel %vm1791_vm8, %v1792_v27, %v1790_v29  ;;  %v1781_v36 = vmul.f32 %v3431_v28, %v1770_v18 }
 0x782   : > { %v1779_v37 = vsel %vm1777_vm7, %v1778_v26, %v1776_v32  ;;  %v1843_v38 = vmul.f32 %v1835_v20, %v1793_v33  ;;  %v1797_v39 = vsel %vm1796_vm9, %v1772_v17, %v1795_v30 }
 0x783   : > { %v1841_v42 = vmul.f32 %v1827_v19, %v1779_v37  ;;  %v1800_v43 = vsel %vm1798_vm10, %v1799_v31, %v1797_v39  ;;  %v1783_v44 = vsel %vm1782_vm11, %v1770_v18, %v1781_v36 }
 0x784   : > { %v1849_v45 = vmul.f32 1.442695, %v1843_v38  ;;  %v1844_v46 = vmul.f32 %v1839_v35, %v1800_v43  ;;  %v1786_v47 = vsel %vm1784_vm12, %v1785_v41, %v1783_v44 }
 0x785   : > { %v1845_v48 = vmul.f32 1.442695, %v1841_v42  ;;  %v1842_v49 = vmul.f32 %v1831_v40, %v1786_v47 }
 0x786   : > { %3432 = vpow2.f32 %v1849_v45  ;;  %v1851_v50 = vmul.f32 1.442695, %v1844_v46 }
 0x787   : > { %3434 = vpow2.f32 %v1845_v48  ;;  %v1847_v51 = vmul.f32 1.442695, %v1842_v49 }
 0x788   : > { %3436 = vpow2.f32 %v1851_v50 }
 0x789   : > { %3438 = vpow2.f32 %v1847_v51 }
 0x790   : > { %v3433_v52 = vpop.eup %3432 }
 0x791   : > { %v3435_v55 = vpop.eup %3434  ;;  %v1855_v56 = vmax.f32 %v3433_v52, 1e-05 }
 0x792   : > { %v3437_v57 = vpop.eup %3436  ;;  %v1853_v58 = vmax.f32 %v3435_v55, 1e-05 }
 0x793   : > { %v3439_v59 = vpop.eup %3438  ;;  %v1859_v61 = vmin.f32 %v1855_v56, 100000.0  ;;  %v1856_v62 = vmax.f32 %v3437_v57, 1e-05 }
 0x794   : > { %v1857_v63 = vmin.f32 %v1853_v58, 100000.0  ;;  %v1854_v1 = vmax.f32 %v3439_v59, 1e-05 }
 0x795   : > { %v1860_v2 = vmin.f32 %v1856_v62, 100000.0  ;;  %v1863_v4 = vmul.f32 %v1859_v61, %v5279_v3 }
 0x796   : > { %v1858_v5 = vmin.f32 %v1854_v1, 100000.0  ;;  %v1861_v7 = vmul.f32 %v1857_v63, %v5269_v54 }
 0x797   : > { %v1864_v8 = vmul.f32 %v1860_v2, %v5284_v10  ;;  %v1867_v14 = vadd.f32 %v1863_v4, %v5267_v53  ;;  %v3400_v4 = vld [vmem:[#allocation29] sm:$0xff]  }
 0x798   : > { %v1865_v9 = vadd.f32 %v1861_v7, %v5267_v53  ;;  %v1862_v11 = vmul.f32 %v1858_v5, %v5274_v60 }
 0x799   : > { %v1875_v3 = vsel %vm1463_vm3, %v1867_v14, -inf  ;;  %v1868_v54 = vadd.f32 %v1864_v8, %v5267_v53  ;;  %v3401_v8 = vld [vmem:[#allocation29 + $0x8] sm:$0xff]  }
 0x79a   : > { %v1869_v12 = vsel %vm1463_vm3, %v1865_v9, -inf  ;;  %v1866_v13 = vadd.f32 %v1862_v11, %v5267_v53 }
 0x79b   : > { %1870 = vmax.xlane.f32.xlu1 %v1869_v12  ;;  %v1878_v10 = vsel %vm1463_vm3, %v1868_v54, -inf }
 0x79c   : > { %v1872_v15 = vsel %vm1463_vm3, %v1866_v13, -inf }
 0x79d   : > { %1873 = vmax.xlane.f32.xlu0 %v1872_v15 }
 0x79f   : > { %1876 = vmax.xlane.f32.xlu1 %v1875_v3 }
 0x7a3   : > { %1879 = vmax.xlane.f32.xlu1 %v1878_v10 }
 0x7b4   : > { %1335 = vrot.lane.b32.xlu1 %v5243_v34, %s4339_s20  ;;  %s4345_s20 = smov [#allocation45]  }
 0x828   : > { %v1871_v60 = vpop.xlane.xlu1 %1870 }
 0x829   : > { %v1881_v16 = vsub.f32 %v1865_v9, %v1871_v60 }
 0x82a   : > { %v1874_v17 = vpop.xlane.xlu0 %1873 }
 0x82b   : > { %v1885_v20 = vmul.f32 1.442695, %v1881_v16  ;;  %v1882_v21 = vsub.f32 %v1866_v13, %v1874_v17 }
 0x82c   : > { %v1877_v18 = vpop.xlane.xlu1 %1876 }
 0x82d   : > { %v1883_v19 = vsub.f32 %v1867_v14, %v1877_v18  ;;  %v1887_v53 = vmul.f32 1.442695, %v1882_v21 }
 0x82f   : > { %v1889_v22 = vmul.f32 1.442695, %v1883_v19 }
 0x830   : > { %v1880_v23 = vpop.xlane.xlu1 %1879 }
 0x831   : > { %3440 = vpow2.f32 %v1889_v22  ;;  %v1884_v24 = vsub.f32 %v1868_v54, %v1880_v23 }
 0x832   : > { %3442 = vpow2.f32 %v1885_v20 }
 0x833   : > { %v1891_v25 = vmul.f32 1.442695, %v1884_v24  ;;  %v2911_v24 = vld [vmem:[#allocation30] ss:$0 sm:$0xff] }
 0x834   : > { %v1336_v26 = vpop.permute.xlu1 %1335 }
 0x835   : > { %3444 = vpow2.f32 %v1891_v25  ;;  %1339 = vst.msk [vmem:[#allocation3 + $0x4] sm:$0xf] %vm1321_vm2, %v1336_v26 }
 0x836   : > { %3446 = vpow2.f32 %v1887_v53 }
 0x83b   : > { %v3441_v27 = vpop.eup %3440 }
 0x83c   : > { %v1899_v28 = vsel %vm1463_vm3, %v3441_v27, 0.0  ;;  %v1460_v29 = vld [vmem:[#allocation3 + $0x4] sm:$0xf]  ;;  %v3443_v30 = vpop.eup %3442 }
 0x83d   : > { %1900 = vadd.xlane.f32.xlu1 %v1899_v28  ;;  %v1971_v31 = vsel %vm1712_vm4, %v1460_v29, 0  ;;  %v1893_v33 = vsel %vm1463_vm3, %v3443_v30, 0.0 }
 0x83e   : > { %3043 = vmatpush3.bf16.msra.mxu1 %v1971_v31 }
 0x83f   : > { %v3445_v32 = vpop.eup %3444  ;;  %3054 = vmatprep.subr.bf16.mxu1 %v4336_v0 }
 0x840   : > { %v1902_v35 = vsel %vm1463_vm3, %v3445_v32, 0.0  ;;  %v3447_v36 = vpop.eup %3446 }
 0x841   : > { %1894 = vadd.xlane.f32.xlu1 %v1893_v33  ;;  %1903 = vadd.xlane.f32.xlu0 %v1902_v35  ;;  %v1896_v37 = vsel %vm1463_vm3, %v3447_v36, 0.0 }
 0x845   : > { %1897 = vadd.xlane.f32.xlu1 %v1896_v37  ;;  %v3402_v37 = vld [vmem:[#allocation35] sm:$0xff]  }
 0x856   : > { %1355 = vrot.lane.b32.xlu1 %v5243_v34, %s4338_s8  ;;  %s4140_s8 = scalar_lea.vmem %s5378_s28, 256 }
 0x857   : > { %1345 = vrot.lane.b32.xlu0 %v5243_v34, %s4340_s21  ;;  %p4141_p11 = scmp.ne.s32.totalorder %s5378_s28, %s4140_s8  ;;  %s4144_s21 = sshll.u32 %s4345_s20, 4  ;;  %s4145_s21 = int_to_ptr.vmem [resolvable:$false] %s4144_s21 }
 0x858   : > { %s4146_s9 = scalar_lea.vmem %s4145_s21, 512  ;;  %p4147_p0 = scmp.lt.s32.totalorder %s5378_s28, %s4145_s21 }
 0x859   : > { %p4142_p3 = pnand %p4141_p11, %p5637_p13  ;;  %p4148_p6 = scmp.lt.s32.totalorder %s4146_s9, %s4140_s8 }
 0x85b   : > { %p4143_p1 = pneg %p4142_p3  ;;  %p4149_p5 = por %p4148_p6, %p4147_p0 }
 0x85d   : > { %p4150_p7 = pnand %p4149_p5, %p4143_p1 }
 0x8ca   : > { %v1901_v38 = vpop.xlane.xlu1 %1900 }
 0x8cb   : > { %3448 = vrcp.f32 %v1901_v38  ;;  %v3403_v38 = vld [vmem:[#allocation35 + $0x8] sm:$0xff]  }
 0x8ce   : > { %v1895_v39 = vpop.xlane.xlu1 %1894  ;;  %v1904_v40 = vpop.xlane.xlu0 %1903 }
 0x8cf   : > { %3450 = vrcp.f32 %v1895_v39 }
 0x8d0   : > { %3452 = vrcp.f32 %v1904_v40 }
 0x8d2   : > { %v1898_v41 = vpop.xlane.xlu1 %1897  ;;  %v1346_v42 = vpop.permute.xlu0 %1345 }
 0x8d3   : > { %3454 = vrcp.f32 %v1898_v41  ;;  %1349 = vst.msk [vmem:[#allocation3 + $0x8] sm:$0xf] %vm1321_vm2, %v1346_v42  ;;  %v2915_v42 = vld [vmem:[#allocation32] ss:$0 sm:$0xff] }
 0x8d5   : > { %v3449_v43 = vpop.eup %3448 }
 0x8d6   : > { %v1911_v44 = vmul.f32 %v3449_v43, %v3441_v27  ;;  %v1356_v45 = vpop.permute.xlu1 %1355 }
 0x8d7   : > { %1359 = vst.msk [vmem:[#allocation3 + $0xc] sm:$0xf] %vm1321_vm2, %v1356_v45 }
 0x8d8   : > { %v1915_v46 = vpack.c.bf16 %v1911_v44, %v1911_v44  ;;  %v2916_v44 = vld [vmem:[#allocation33] ss:$0 sm:$0xff] }
 0x8d9   : > { %v3451_v47 = vpop.eup %3450 }
 0x8da   : > { %v3453_v34 = vpop.eup %3452  ;;  %v1909_v48 = vmul.f32 %v3451_v47, %v3443_v30  ;;  %1919 = vst.msk [vmem:[%s5329_s16 + $0x8] sm:$0xf] %vm1321_vm2, %v1915_v46  ;;  %v1461_v50 = vld [vmem:[#allocation3 + $0x8] sm:$0xf] }
 0x8db   : > { %v1912_v49 = vmul.f32 %v3453_v34, %v3445_v32  ;;  %v2017_v57 = vsel %vm1712_vm4, %v1461_v50, 0  ;;  %v3404_v34 = vld [vmem:[#allocation38] sm:$0xff]   ;;  %v3407_v50 = vld [vmem:[#allocation38 + $0x18] sm:$0xff]  }
 0x8dc   : > { %v1913_v51 = vpack.c.bf16 %v1909_v48, %v1909_v48  ;;  %v3405_v48 = vld [vmem:[#allocation38 + $0x8] sm:$0xff]  }
 0x8dd   : > { %v3455_v52 = vpop.eup %3454  ;;  %v1916_v55 = vpack.c.bf16 %v1912_v49, %v1912_v49  ;;  %v3406_v49 = vld [vmem:[#allocation38 + $0x10] sm:$0xff]  }
 0x8de   : > { %v1910_v56 = vmul.f32 %v3455_v52, %v3447_v36  ;;  %1917 = vst.msk [vmem:[%s5329_s16] sm:$0xf] %vm1321_vm2, %v1913_v51  ;;  %3039 = vmatmul.mubr.msk.bf16.vlgmr.msra.gmra.mrb[12].mxu0 %vm1463_vm3, %v1913_v51  ;;  %v1462_v58 = vld [vmem:[#allocation3 + $0xc] sm:$0xf]  ;;  %v2917_v51 = vld [vmem:[#allocation36] ss:$0 sm:$0xff] }
 0x8df   : > { %3049 = vmatpush3.bf16.msra.mxu0 %v2017_v57  ;;  %3050 = vmatprep.mubr.msk.bf16.mxu0 %vm4337_vm0, %v4336_v0  ;;  %1920 = vst.msk [vmem:[%s5329_s16 + $0xc] sm:$0xf] %vm1321_vm2, %v1916_v55  ;;  %v2063_v61 = vsel %vm1712_vm4, %v1462_v58, 0 }
 0x8e0   : > { %v1914_v59 = vpack.c.bf16 %v1910_v56, %v1910_v56  ;;  %3060 = vmatprep.subr.bf16.mxu0 %v4336_v0 }
 0x8e2   : > { %1918 = vst.msk [vmem:[%s5329_s16 + $0x4] sm:$0xf] %vm1321_vm2, %v1914_v59  ;;  %3045 = vmatmul.mubr.msk.bf16.vlgmr.msra.gmra.mrb[20].mxu1 %vm1463_vm3, %v1914_v59 }
 0x8e3   : > { %3055 = vmatpush3.bf16.msra.mxu1 %v2063_v61  ;;  %3056 = vmatprep.mubr.msk.bf16.mxu1 %vm4337_vm0, %v4336_v0 }
 0x8e4   : > { %3068 = vmatprep.subr.bf16.mxu1 %v4336_v0 }
 0x8e6   : > { %3051 = vmatmul.mubr.msk.bf16.vlgmr.msra.gmra.mrb[16].mxu0 %vm1463_vm3, %v1915_v46 }
 0x8e7   : > { %3064 = vmatprep.mubr.msk.bf16.mxu0 %vm4337_vm0, %v4336_v0  ;;  %3061 = vmatpush3.bf16.msra.mxu0 %v3400_v4  ;;  %v2921_v4 = vld [vmem:[#allocation39] ss:$0 sm:$0xff] }
 0x8e8   : > { %3062 = vmatprep.subr.bf16.mxu0 %v4336_v0 }
 0x8ea   : > { %3057 = vmatmul.mubr.msk.bf16.vlgmr.msra.gmra.mrb[24].mxu1 %vm1463_vm3, %v1916_v55 }
 0x8eb   : > { %3072 = vmatprep.mubr.msk.bf16.mxu1 %vm4337_vm0, %v4336_v0  ;;  %3063 = vmatpush3.bf16.msra.mxu0 %v3401_v8 }
 0x8ec   : > { %3076 = vmatprep.subr.bf16.mxu0 %v4336_v0  ;;  %3069 = vmatpush3.bf16.msra.mxu1 %v3402_v37 }
 0x8ed   : > { %3070 = vmatprep.subr.bf16.mxu1 %v4336_v0 }
 0x8f0   : > { %3071 = vmatpush3.bf16.msra.mxu1 %v3403_v38 }
 0x9b1   : > { %v1961_v62 = vpop.f32.mrb[12].mxu0 }
 0x9b2   : > { %v2105_v63 = vpack.c.bf16 %v1961_v62, %v1961_v62  ;;  %v3040_v1 = vpop.f32.mrb[13].mxu0 }
 0x9b3   : > { %v1964_v2 = vpop.f32.mrb[14].mxu0 }
 0x9b4   : > { %2106 = vst.msk [vmem:[#allocation5] sm:$0xf] %vm1321_vm2, %v2105_v63  ;;  %v3041_v5 = vpop.f32.mrb[15].mxu0 }
 0x9b5   : > { %v2007_v7 = vpop.f32.mrb[20].mxu1 }
 0x9b6   : > { %v2939_v9 = vpack.c.bf16 %v2007_v7, %v2007_v7  ;;  %v3046_v11 = vpop.f32.mrb[21].mxu1 }
 0x9b7   : > { %v2010_v12 = vpop.f32.mrb[22].mxu1 }
 0x9b8   : > { %2111 = vrot.lane.b32.xlu1 %v2939_v9, %s4342_s1  ;;  %v3047_v13 = vpop.f32.mrb[23].mxu1 }
 0x9b9   : > { %v2053_v14 = vpop.f32.mrb[16].mxu0 }
 0x9ba   : > { %v2940_v15 = vpack.c.bf16 %v2053_v14, %v2053_v14  ;;  %v3052_v3 = vpop.f32.mrb[17].mxu0 }
 0x9bb   : > { %v2056_v54 = vpop.f32.mrb[18].mxu0 }
 0x9bc   : > { %2120 = vrot.lane.b32.xlu0 %v2940_v15, %s4343_s30  ;;  %v3053_v10 = vpop.f32.mrb[19].mxu0 }
 0x9bd   : > { %v2099_v60 = vpop.f32.mrb[24].mxu1 }
 0x9be   : > { %v2941_v16 = vpack.c.bf16 %v2099_v60, %v2099_v60  ;;  %v3058_v17 = vpop.f32.mrb[25].mxu1 }
 0x9bf   : > { %v2102_v18 = vpop.f32.mrb[26].mxu1 }
 0x9c0   : > { %2129 = vrot.lane.b32.xlu1 %v2941_v16, %s4344_s0  ;;  %v3059_v19 = vpop.f32.mrb[27].mxu1 }
 0xa2a   : > { %v2112_v20 = vpop.permute.xlu1 %2111 }
 0xa2b   : > { %2115 = vst.msk [vmem:[#allocation5] sm:$0xf] %vm2114_vm13, %v2112_v20 }
 0xa2e   : > { %v2121_v21 = vpop.permute.xlu0 %2120 }
 0xa2f   : > { %2124 = vst.msk [vmem:[#allocation5] sm:$0xf] %vm2123_vm14, %v2121_v21 }
 0xa32   : > { %v2130_v22 = vpop.permute.xlu1 %2129 }
 0xa33   : > { %2133 = vst.msk [vmem:[#allocation5] sm:$0xf] %vm2132_vm15, %v2130_v22 }
 0xa3a   : > { %v2134_v23 = vld [vmem:[#allocation5] sm:$0xf] }
 0xa3b   : > { %3065 = vmatmul.mubr.msk.bf16.vlgmr.msra.gmra.mrb[20].mxu0 %vm1208_vm1, %v2134_v23 }
 0xa3c   : > { %3084 = vmatprep.mubr.msk.bf16.mxu0 %vm4337_vm0, %v4336_v0  ;;  %3077 = vmatpush3.bf16.msra.mxu0 %v3404_v34  ;;  %vm2344_vm0 = vcmask 523264  }
 0xa3d   : > { %3078 = vmatprep.subr.bf16.mxu0 %v4336_v0 }
 0xa40   : > { %3079 = vmatpush3.bf16.msra.mxu0 %v3405_v48 }
 0xa41   : > { %3080 = vmatprep.subr.bf16.mxu0 %v4336_v0 }
 0xa44   : > { %3081 = vmatpush3.bf16.msra.mxu0 %v3406_v49 }
 0xa45   : > { %3082 = vmatprep.subr.bf16.mxu0 %v4336_v0 }
 0xa48   : > { %3083 = vmatpush3.bf16.msra.mxu0 %v3407_v50 }
 0xb0e   : > { %v2195_v53 = vpop.f32.mrb[20].mxu0 }
 0xb0f   : > { %v2196_v25 = vadd.f32 %v2911_v24, %v2195_v53  ;;  %v3066_v26 = vpop.f32.mrb[21].mxu0 }
 0xb10   : > { %v2198_v27 = vpop.f32.mrb[22].mxu0 }
 0xb11   : > { %v3067_v28 = vpop.f32.mrb[23].mxu0  ;;  %v2201_v29 = vadd.f32 %v2196_v25, %v5212_v6 }
 0xb13   : > { %v2204_v30 = vsel %vm1208_vm1, %v2201_v29, 0.0 }
 0xb14   : > { %2205 = vadd.xlane.f32.xlu0 %v2204_v30 }
 0xba1   : > { %v2206_v31 = vpop.xlane.xlu0 %2205 }
 0xba2   : > { %v2208_v32 = vmul.f32 0.03125, %v2206_v31 }
 0xba4   : > { %v2209_v33 = vsub.f32 %v2201_v29, %v2208_v32 }
 0xba6   : > { %v2210_v35 = vmul.f32 %v2209_v33, %v2209_v33 }
 0xba8   : > { %v2211_v36 = vsel %vm1208_vm1, %v2210_v35, 0.0 }
 0xba9   : > { %2212 = vadd.xlane.f32.xlu1 %v2211_v36 }
 0xc36   : > { %v2213_v39 = vpop.xlane.xlu1 %2212 }
 0xc37   : > { %v2214_v40 = vmul.f32 0.03125, %v2213_v39 }
 0xc39   : > { %v2215_v41 = vadd.f32 1e-05, %v2214_v40 }
 0xc3b   : > { %3456 = vrsqrt.f32 %v2215_v41 }
 0xc45   : > { %v3457_v6 = vpop.eup %3456 }
 0xc46   : > { %v2217_v43 = vmul.f32 %v3457_v6, %v2209_v33 }
 0xc48   : > { %v2224_v45 = vmul.f32 %v2915_v42, %v2217_v43 }
 0xc4a   : > { %v2231_v46 = vadd.f32 %v2916_v44, %v2224_v45 }
 0xc4c   : > { %v2232_v47 = vpack.c.bf16 %v2231_v46, %v2231_v46 }
 0xc4e   : > { %3073 = vmatmul.mubr.msk.bf16.vlgmr.msra.gmra.mrb[28].mxu1 %vm1208_vm1, %v2232_v47 }
 0xd21   : > { %v2293_v52 = vpop.f32.mrb[28].mxu1 }
 0xd22   : > { %v2294_v55 = vadd.f32 %v2917_v51, %v2293_v52  ;;  %v3074_v56 = vpop.f32.mrb[29].mxu1 }
 0xd23   : > { %v2296_v57 = vpop.f32.mrb[30].mxu1 }
 0xd24   : > { %v2300_v58 = vmul.f32 0.70710677, %v2294_v55  ;;  %v3075_v59 = vpop.f32.mrb[31].mxu1  ;;  %v2299_v62 = vmul.f32 0.5, %v2294_v55 }
 0xd26   : > { %3458 = verf.f32 %v2300_v58 }
 0xd30   : > { %v3459_v61 = vpop.eup %3458 }
 0xd31   : > { %v2302_v63 = vadd.f32 1.0, %v3459_v61 }
 0xd33   : > { %v2303_v1 = vmul.f32 %v2302_v63, %v2299_v62 }
 0xd35   : > { %v2304_v2 = vpack.c.bf16 %v2303_v1, %v2303_v1 }
 0xd37   : > { %3085 = vmatmul.mubr.msk.bf16.vlgmr.msra.gmra.mrb[24].mxu0 %vm2344_vm0, %v2304_v2 }
 0xe0a   : > { %v2382_v0 = vpop.f32.mrb[24].mxu0 }
 0xe0b   : > { %v2383_v5 = vadd.f32 %v2921_v4, %v2382_v0  ;;  %v3086_v7 = vpop.f32.mrb[25].mxu0 }
 0xe0c   : > { %v2385_v8 = vpop.f32.mrb[26].mxu0 }
 0xe0d   : > { %v3087_v9 = vpop.f32.mrb[27].mxu0  ;;  %v2388_v11 = vadd.f32 %v2383_v5, %v2231_v46 }
 0xe0f   : > { %v2391_v12 = vsel %vm1208_vm1, %v2388_v11, 0.0 }
 0xe10   : > { %2392 = vadd.xlane.f32.xlu0 %v2391_v12 }
 0xe9d   : > { %v2393_v13 = vpop.xlane.xlu0 %2392 }
 0xe9e   : > { %v2394_v14 = vmul.f32 0.03125, %v2393_v13 }
 0xea0   : > { %v2395_v15 = vsub.f32 %v2388_v11, %v2394_v14 }
 0xea2   : > { %v2396_v3 = vmul.f32 %v2395_v15, %v2395_v15 }
 0xea4   : > { %v2397_v54 = vsel %vm1208_vm1, %v2396_v3, 0.0 }
 0xea5   : > { %2398 = vadd.xlane.f32.xlu0 %v2397_v54 }
 0xea6   : > { %4153 = shalt.err (!%p4150_p7)
}
 0xea7   : > { %s4154_s16 = scalar_lea.hbm %s5376_s11, 256  ;;  %s4158_s0 = scalar_lea.hbm %s5636_s19, 512 }
 0xea8   : > { %p4155_p9 = scmp.ne.s32.totalorder %s5376_s11, %s4154_s16  ;;  %p4159_p2 = scmp.lt.u32.totalorder %s5376_s11, %s5636_s19 }
 0xea9   : > { %p4160_p4 = scmp.lt.u32.totalorder %s4158_s0, %s4154_s16  ;;  %p4162_p11 = scmp.lt.u32.totalorder %s4154_s16, %s5376_s11 }
 0xeaa   : > { %p4156_p8 = pnand %p4155_p9, %p5637_p13 }
 0xeab   : > { %p4161_p12 = por %p4160_p4, %p4159_p2 }
 0xeac   : > { %p4157_p10 = pneg %p4156_p8 }
 0xead   : > { %p4163_p3 = por %p4162_p11, %p4161_p12 }
 0xeaf   : > { %p4164_p1 = pnand %p4163_p3, %p4157_p10 }
 0xeb1   : > { %4167 = shalt.err (!%p4164_p1)
}
 0xeb2   : > { %s4346_s13 = smov 64   ;;  %s4347_s6 = smov 4   ;;  %v2927_v18 = vld [vmem:[#allocation41] ss:$0 sm:$0xff]  ;;  %v2928_v20 = vld [vmem:[#allocation42] ss:$0 sm:$0xff] }
 0xeb3   : > { %3180 = dma.vmem_to_hbm [thread:$0]  (%p5637_p13), %s5378_s28, 256, %s5376_s11, %s2425_s15, %s4346_s13, %s4346_s13, %s4347_s6  }
 0xeb4   : > { %s2931_s8 = sshll.u32 %s5634_s12, 7  ;;  %s1171_s20 = scalar_lea.vmem [#allocation44], %s2854_s17 }
 0xeb5   : > { %s2439_s21 = sshll.u32 %s1171_s20, 4  ;;  %s5638_s1 = sld [smem:[#allocation93_spill]]  ;;  %s5412_s21 = int_to_ptr.vmem [resolvable:$true] %s2439_s21 }
 0xeb6   : > { %s2420_s11 = scalar_lea.sflag [#allocation8], %s5138_s22  ;;  %s4168_s15 = scalar_lea.vmem %s5412_s21, 128 }
 0xeb7   : > { %p4169_p0 = scmp.ne.s32.totalorder %s5412_s21, %s4168_s15  ;;  %s4348_s17 = smov [#allocation44]  }
 0xeb8   : > { %s4172_s12 = sshll.u32 %s4348_s17, 4  ;;  %s4173_s12 = int_to_ptr.vmem [resolvable:$false] %s4172_s12 }
 0xeb9   : > { %p4170_p6 = pnand %p4169_p0, %p5637_p13  ;;  %s4174_s30 = scalar_lea.vmem %s4173_s12, 256 }
 0xeba   : > { %p4175_p7 = scmp.lt.s32.totalorder %s5412_s21, %s4173_s12  ;;  %p4176_p9 = scmp.lt.s32.totalorder %s4174_s30, %s4168_s15 }
 0xebb   : > { %s5410_s28 = scalar_lea.hbm %s5638_s1, %s2931_s8  ;;  %p4171_p5 = pneg %p4170_p6 }
 0xebc   : > { %p4177_p8 = por %p4176_p9, %p4175_p7 }
 0xebe   : > { %p4178_p10 = pnand %p4177_p8, %p4171_p5 }
 0xf32   : > { %v2399_v10 = vpop.xlane.xlu0 %2398 }
 0xf33   : > { %v2400_v60 = vmul.f32 0.03125, %v2399_v10 }
 0xf35   : > { %v2401_v16 = vadd.f32 1e-05, %v2400_v60 }
 0xf37   : > { %3460 = vrsqrt.f32 %v2401_v16 }
 0xf41   : > { %v3461_v17 = vpop.eup %3460 }
 0xf42   : > { %v2403_v19 = vmul.f32 %v3461_v17, %v2395_v15 }
 0xf44   : > { %v2410_v21 = vmul.f32 %v2927_v18, %v2403_v19 }
 0xf46   : > { %v2417_v22 = vadd.f32 %v2928_v20, %v2410_v21 }
 0xf48   : > { %2418 = vst.msk [vmem:[%s1171_s20] sm:$0xff] %vm1208_vm1, %v2417_v22 }
 0xf49   : > { %4181 = shalt.err (!%p4178_p10)
}
 0xf4a   : > { %s4182_s22 = scalar_lea.hbm %s5410_s28, 128  ;;  %s4186_s18 = scalar_lea.hbm %s5638_s1, 256 }
 0xf4b   : > { %p4183_p2 = scmp.ne.s32.totalorder %s5410_s28, %s4182_s22  ;;  %p4187_p11 = scmp.lt.u32.totalorder %s5410_s28, %s5638_s1 }
 0xf4c   : > { %p4188_p3 = scmp.lt.u32.totalorder %s4186_s18, %s4182_s22  ;;  %p4190_p0 = scmp.lt.u32.totalorder %s4182_s22, %s5410_s28 }
 0xf4d   : > { %p4184_p4 = pnand %p4183_p2, %p5637_p13 }
 0xf4e   : > { %p4189_p1 = por %p4188_p3, %p4187_p11 }
 0xf4f   : > { %p4185_p12 = pneg %p4184_p4 }
 0xf50   : > { %p4191_p6 = por %p4190_p0, %p4189_p1 }
 0xf52   : > { %p4192_p5 = pnand %p4191_p6, %p4185_p12 }
 0xf54   : > { %4195 = shalt.err (!%p4192_p5)
}
 0xf55   : > { %3179 = dma.vmem_to_hbm [thread:$0]  (%p5637_p13), %s5412_s21, 128, %s5410_s28, %s2420_s11  }
 0xf56 PF: > { %s5639_s8 = sld [smem:[#allocation68_spill]]  ;;  %s2468_s20 = sand.u32 1, %s4286_s29  }
 0xf57   : > { %p5641_p9 = scmp.ge.s32.totalorder %s4306_s3, 2  ;;  %s2469_s9 = scalar_lea.sflag [#allocation8], %s2468_s20 }
 0xf5c   : > { %p5640_p7 = scmp.ne.s32.totalorder %s5639_s8, 0 }
 0xf5e   : > { %p3258_p8 = pnand %p5641_p9, %p5640_p7 }
 0xf60   : > { %4277 = dma.done.wait (!%p3258_p8), %s2469_s9, 128  }
 0xf61   : > { %4279 = vsyncadd (!%p3258_p8), %s2469_s9, 4294967168  ;;  %s2478_s16 = scalar_lea.sflag [#allocation46], %s2468_s20 }
 0xf62   : > { %4281 = dma.done.wait (!%p3258_p8), %s2478_s16, 256  }
 0xf63   : > { %4283 = vsyncadd (!%p3258_p8), %s2478_s16, 4294967040  ;;  %s59_s3 = sadd.s32 1, %s4306_s3   ;;  %s5642_s27 = sld [smem:[#allocation63_spill]] }
 0xf64   : > { %p56_p10 = scmp.ge.s32.totalorder %s59_s3, 4   ;;  %s5643_s6 = sld [smem:[#allocation67_spill]] }
 0xf65   : > { %s5644_s21 = sld [smem:[#allocation66_spill]]  ;;  %s5645_s29 = smov %s4290_s2 }
 0xf66   : > { %s5647_s30 = smov %s4302_s7  ;;  %58 = sbr.rel (!%p56_p10) target bundleno = 48 (0x30), region = 303 }
 0xf69   : > { %s5646_s2 = smov %s5642_s27 }
 0xf6b   : > { %s5648_s7 = smov %s5644_s21 }
 0xf6d   :  { %2483 = vsyncpa [#allocation7], 1 }
 0xf6e   :  { %2485 = vsyncpa [#allocation7 + $0x1], 1 }
 0xf6f   :  { %2486 = vsyncpa [#allocation10], 1 }
 0xf70   :  { %2488 = vsyncpa [#allocation10 + $0x1], 1 }
 0xf71   :  { %2489 = vsyncpa [#allocation13], 1 }
 0xf72   :  { %2491 = vsyncpa [#allocation13 + $0x1], 1 }
 0xf73   :  { %2492 = vsyncpa [#allocation16], 1 }
 0xf74   :  { %2493 = vsyncpa [#allocation19], 1 }
 0xf75   :  { %2494 = vsyncpa [#allocation22], 1 }
 0xf76   :  { %2495 = vsyncpa [#allocation25], 1 }
 0xf77   :  { %2496 = vsyncpa [#allocation28], 1 }
 0xf78   :  { %2497 = vsyncpa [#allocation31], 1 }
 0xf79   :  { %2498 = vsyncpa [#allocation34], 1 }
 0xf7a   :  { %2499 = vsyncpa [#allocation37], 1 }
 0xf7b   :  { %2500 = vsyncpa [#allocation40], 1 }
 0xf7c   :  { %2501 = vsyncpa [#allocation43], 1 }
 0xf7d   :  { %2502 = vsyncpa [#allocation8], 1 }
 0xf7e   :  { %2504 = vsyncpa [#allocation8 + $0x1], 1 }
 0xf7f   :  { %2505 = vsyncpa [#allocation46], 1 }
 0xf80   :  { %2507 = vsyncpa [#allocation46 + $0x1], 1 }

</bundles_post_ra>
